<compile_context>
chip_gen: v7x
topology: tpu7x:2x2x1
jax: 0.10.0
libtpu: 0.0.40
codegen_flags: <defaults>
</compile_context>

<pallas_src>
import jax
import jax.numpy as jnp
from jax.experimental import pallas as pl
from jax.experimental.pallas import tpu as pltpu

# encoder: 3->128->64->32->16 (ReLU after each)
# decoder: 16->32->64->128->3 (ReLU after all but the last)
LAYER_DIMS = [3, 128, 64, 32, 16, 32, 64, 128, 3]
N_LAYERS = len(LAYER_DIMS) - 1      # 8
PAD = 128                           # uniform 128x128 MXU tile per layer


def autoencoder_kernel(x_ref, w_ref, b_ref, out_ref):
    """x_ref: [tile_b, 128] zero-padded activations; w_ref: [8, 128, 128]
    packed (possibly bf16) weights; b_ref: [8, 1, 128] f32 biases;
    out_ref: [tile_b, 128] (only the first 3 lanes are meaningful)."""
    compute_dtype = w_ref.dtype
    h = x_ref[...].astype(jnp.float32)
    for i in range(N_LAYERS):
        acc = jnp.dot(h.astype(compute_dtype), w_ref[i],
                      preferred_element_type=jnp.float32)
        h = acc + b_ref[i]                       # (tile_b,128) + (1,128), f32
        if i != N_LAYERS - 1:                    # final decoder Linear: no ReLU
            h = jnp.maximum(h, 0.0)
        # nn.Dropout(0.2) after layers 0,1,4,5 is identity in eval mode.
    out_ref[...] = h.astype(out_ref.dtype)


def init_params(key):
    """Deterministic PyTorch-Linear-style uniform init; weights as [in, out]."""
    params = []
    for i in range(N_LAYERS):
        fan_in, fan_out = LAYER_DIMS[i], LAYER_DIMS[i + 1]
        key, kw, kb = jax.random.split(key, 3)
        bound = 1.0 / (fan_in ** 0.5)
        w = jax.random.uniform(kw, (fan_in, fan_out), jnp.float32, -bound, bound)
        b = jax.random.uniform(kb, (fan_out,), jnp.float32, -bound, bound)
        params.append((w, b))
    return params


def pack_params(params, compute_dtype=jnp.float32):
    """Zero-pad every layer to a uniform [128,128] tile and stack.

    Padded rows/cols and bias lanes are exactly zero (required so garbage
    lanes never leak into valid outputs).  compute_dtype=jnp.bfloat16 enables
    the faster bf16 MXU path on v6e/v7x (loosen test tolerance if used).
    """
    w_packed = jnp.zeros((N_LAYERS, PAD, PAD), jnp.float32)
    b_packed = jnp.zeros((N_LAYERS, 1, PAD), jnp.float32)
    for i, (w, b) in enumerate(params):
        fi, fo = w.shape
        w_packed = w_packed.at[i, :fi, :fo].set(w)
        b_packed = b_packed.at[i, 0, :fo].set(b)
    return w_packed.astype(compute_dtype), b_packed


def complex_autoencoder(x, w_packed, b_packed, *, tile_b=256):
    """x: [B, 3] -> [B, 3].  tile_b is the primary tuning knob (multiple of
    128; 256+ fills the v6e/v7x MXU row groups).  Keep tile_b < B on v7x so
    the parallel batch grid spans both TensorCores; at tile_b=256 the VMEM
    footprint (~2 MiB total) is far under the 32 MiB scoped default."""
    B, F = x.shape
    assert F == LAYER_DIMS[0]

    n_tiles = pl.cdiv(B, tile_b)
    b_pad = n_tiles * tile_b
    # Zero-pad features to 128 lanes and batch to a tile multiple.  The padded
    # feature lanes multiply against zero weight rows, so results are exact.
    x_pad = jnp.zeros((b_pad, PAD), x.dtype).at[:B, :F].set(x)

    w_bytes = w_packed.size * jnp.dtype(w_packed.dtype).itemsize
    cost = pl.CostEstimate(
        flops=2 * b_pad * N_LAYERS * PAD * PAD,
        transcendentals=0,
        bytes_accessed=2 * b_pad * PAD * 4 + w_bytes + b_packed.size * 4,
    )

    out_pad = pl.pallas_call(
        autoencoder_kernel,
        out_shape=jax.ShapeDtypeStruct((b_pad, PAD), x.dtype),
        grid_spec=pltpu.PrefetchScalarGridSpec(
            num_scalar_prefetch=0,
            grid=(n_tiles,),
            in_specs=[
                pl.BlockSpec((tile_b, PAD), lambda i: (i, 0)),
                pl.BlockSpec((N_LAYERS, PAD, PAD), lambda i: (0, 0, 0)),
                pl.BlockSpec((N_LAYERS, 1, PAD), lambda i: (0, 0, 0)),
            ],
            out_specs=pl.BlockSpec((tile_b, PAD), lambda i: (i, 0)),
        ),
        compiler_params=pltpu.CompilerParams(
            dimension_semantics=("parallel",)),
        cost_estimate=cost,
    )(x_pad, w_packed, b_packed)

    # Only the first 3 lanes / first B rows are real data.
    return out_pad[:B, :LAYER_DIMS[-1]]


def reference_forward(x, params):
    h = x.astype(jnp.float32)
    for i, (w, b) in enumerate(params):
        h = h @ w + b
        if i != N_LAYERS - 1:
            h = jnp.maximum(h, 0.0)
    return h


if __name__ == "__main__":
    key = jax.random.PRNGKey(0)
    key, kx = jax.random.split(key)

    batch = 16
    x = jax.random.normal(kx, (batch, 3), jnp.float32)
    params = init_params(key)
    w_packed, b_packed = pack_params(params)          # f32 compute path

    out = complex_autoencoder(x, w_packed, b_packed, tile_b=256)
    out = jax.block_until_ready(out)

    ref = reference_forward(x, params)
    assert out.shape == (batch, 3)
    assert jnp.allclose(out, ref, atol=1e-4, rtol=1e-4)

    print("KERNEL_OK")
</pallas_src>

<mosaic_0001>
module attributes {stable_mosaic.version = 11 : i64} {
  func.func @autoencoder_kernel(%arg0: i32, %arg1: memref<256x128xf32, #tpu.memory_space<vmem>>, %arg2: memref<8x128x128xf32, #tpu.memory_space<vmem>>, %arg3: memref<8x1x128xf32, #tpu.memory_space<vmem>>, %arg4: memref<256x128xf32, #tpu.memory_space<vmem>>) attributes {dimension_semantics = [#tpu.dimension_semantics<parallel>], iteration_bounds = array<i64: 1>, scalar_prefetch = 0 : i64, scratch_operands = 0 : i64, tpu.core_type = #tpu.core_type<tc>, window_params = [{transform_indices = @transform_0, window_bounds = array<i64: 256, 128>}, {pipeline_mode = #tpu.pipeline_mode<synchronous>, transform_indices = @transform_1, window_bounds = array<i64: 8, 128, 128>}, {pipeline_mode = #tpu.pipeline_mode<synchronous>, transform_indices = @transform_2, window_bounds = array<i64: 8, 1, 128>}, {transform_indices = @transform_3, window_bounds = array<i64: 256, 128>}]} {
    %c0 = arith.constant 0 : index
    %c0_0 = arith.constant 0 : index
    %0 = vector.load %arg1[%c0, %c0_0] : memref<256x128xf32, #tpu.memory_space<vmem>>, vector<256x128xf32>
    %c0_1 = arith.constant 0 : index
    %c0_2 = arith.constant 0 : index
    %c0_3 = arith.constant 0 : index
    %1 = vector.load %arg2[%c0_1, %c0_2, %c0_3] : memref<8x128x128xf32, #tpu.memory_space<vmem>>, vector<1x128x128xf32>
    %2 = vector.shape_cast %1 : vector<1x128x128xf32> to vector<128x128xf32>
    %cst = arith.constant dense<0.000000e+00> : vector<256x128xf32>
    %3 = tpu.matmul %0, %2, %cst {dimension_numbers = #tpu.dot_dimension_numbers<[1], [0], [0], [1], [0, 0, 1, 1], [], []>} : vector<256x128xf32>, vector<128x128xf32>, vector<256x128xf32> -> vector<256x128xf32>
    %c0_4 = arith.constant 0 : index
    %c0_5 = arith.constant 0 : index
    %c0_6 = arith.constant 0 : index
    %4 = vector.load %arg3[%c0_4, %c0_5, %c0_6] : memref<8x1x128xf32, #tpu.memory_space<vmem>>, vector<1x1x128xf32>
    %5 = vector.shape_cast %4 : vector<1x1x128xf32> to vector<1x128xf32>
    %6 = vector.broadcast %5 : vector<1x128xf32> to vector<256x128xf32>
    %7 = arith.addf %3, %6 : vector<256x128xf32>
    %cst_7 = arith.constant 0.000000e+00 : f32
    %8 = vector.broadcast %cst_7 : f32 to vector<256x128xf32>
    %9 = arith.maximumf %7, %8 : vector<256x128xf32>
    %c1 = arith.constant 1 : index
    %c0_8 = arith.constant 0 : index
    %c0_9 = arith.constant 0 : index
    %10 = vector.load %arg2[%c1, %c0_8, %c0_9] : memref<8x128x128xf32, #tpu.memory_space<vmem>>, vector<1x128x128xf32>
    %11 = vector.shape_cast %10 : vector<1x128x128xf32> to vector<128x128xf32>
    %cst_10 = arith.constant dense<0.000000e+00> : vector<256x128xf32>
    %12 = tpu.matmul %9, %11, %cst_10 {dimension_numbers = #tpu.dot_dimension_numbers<[1], [0], [0], [1], [0, 0, 1, 1], [], []>} : vector<256x128xf32>, vector<128x128xf32>, vector<256x128xf32> -> vector<256x128xf32>
    %c1_11 = arith.constant 1 : index
    %c0_12 = arith.constant 0 : index
    %c0_13 = arith.constant 0 : index
    %13 = vector.load %arg3[%c1_11, %c0_12, %c0_13] : memref<8x1x128xf32, #tpu.memory_space<vmem>>, vector<1x1x128xf32>
    %14 = vector.shape_cast %13 : vector<1x1x128xf32> to vector<1x128xf32>
    %15 = vector.broadcast %14 : vector<1x128xf32> to vector<256x128xf32>
    %16 = arith.addf %12, %15 : vector<256x128xf32>
    %cst_14 = arith.constant 0.000000e+00 : f32
    %17 = vector.broadcast %cst_14 : f32 to vector<256x128xf32>
    %18 = arith.maximumf %16, %17 : vector<256x128xf32>
    %c2 = arith.constant 2 : index
    %c0_15 = arith.constant 0 : index
    %c0_16 = arith.constant 0 : index
    %19 = vector.load %arg2[%c2, %c0_15, %c0_16] : memref<8x128x128xf32, #tpu.memory_space<vmem>>, vector<1x128x128xf32>
    %20 = vector.shape_cast %19 : vector<1x128x128xf32> to vector<128x128xf32>
    %cst_17 = arith.constant dense<0.000000e+00> : vector<256x128xf32>
    %21 = tpu.matmul %18, %20, %cst_17 {dimension_numbers = #tpu.dot_dimension_numbers<[1], [0], [0], [1], [0, 0, 1, 1], [], []>} : vector<256x128xf32>, vector<128x128xf32>, vector<256x128xf32> -> vector<256x128xf32>
    %c2_18 = arith.constant 2 : index
    %c0_19 = arith.constant 0 : index
    %c0_20 = arith.constant 0 : index
    %22 = vector.load %arg3[%c2_18, %c0_19, %c0_20] : memref<8x1x128xf32, #tpu.memory_space<vmem>>, vector<1x1x128xf32>
    %23 = vector.shape_cast %22 : vector<1x1x128xf32> to vector<1x128xf32>
    %24 = vector.broadcast %23 : vector<1x128xf32> to vector<256x128xf32>
    %25 = arith.addf %21, %24 : vector<256x128xf32>
    %cst_21 = arith.constant 0.000000e+00 : f32
    %26 = vector.broadcast %cst_21 : f32 to vector<256x128xf32>
    %27 = arith.maximumf %25, %26 : vector<256x128xf32>
    %c3 = arith.constant 3 : index
    %c0_22 = arith.constant 0 : index
    %c0_23 = arith.constant 0 : index
    %28 = vector.load %arg2[%c3, %c0_22, %c0_23] : memref<8x128x128xf32, #tpu.memory_space<vmem>>, vector<1x128x128xf32>
    %29 = vector.shape_cast %28 : vector<1x128x128xf32> to vector<128x128xf32>
    %cst_24 = arith.constant dense<0.000000e+00> : vector<256x128xf32>
    %30 = tpu.matmul %27, %29, %cst_24 {dimension_numbers = #tpu.dot_dimension_numbers<[1], [0], [0], [1], [0, 0, 1, 1], [], []>} : vector<256x128xf32>, vector<128x128xf32>, vector<256x128xf32> -> vector<256x128xf32>
    %c3_25 = arith.constant 3 : index
    %c0_26 = arith.constant 0 : index
    %c0_27 = arith.constant 0 : index
    %31 = vector.load %arg3[%c3_25, %c0_26, %c0_27] : memref<8x1x128xf32, #tpu.memory_space<vmem>>, vector<1x1x128xf32>
    %32 = vector.shape_cast %31 : vector<1x1x128xf32> to vector<1x128xf32>
    %33 = vector.broadcast %32 : vector<1x128xf32> to vector<256x128xf32>
    %34 = arith.addf %30, %33 : vector<256x128xf32>
    %cst_28 = arith.constant 0.000000e+00 : f32
    %35 = vector.broadcast %cst_28 : f32 to vector<256x128xf32>
    %36 = arith.maximumf %34, %35 : vector<256x128xf32>
    %c4 = arith.constant 4 : index
    %c0_29 = arith.constant 0 : index
    %c0_30 = arith.constant 0 : index
    %37 = vector.load %arg2[%c4, %c0_29, %c0_30] : memref<8x128x128xf32, #tpu.memory_space<vmem>>, vector<1x128x128xf32>
    %38 = vector.shape_cast %37 : vector<1x128x128xf32> to vector<128x128xf32>
    %cst_31 = arith.constant dense<0.000000e+00> : vector<256x128xf32>
    %39 = tpu.matmul %36, %38, %cst_31 {dimension_numbers = #tpu.dot_dimension_numbers<[1], [0], [0], [1], [0, 0, 1, 1], [], []>} : vector<256x128xf32>, vector<128x128xf32>, vector<256x128xf32> -> vector<256x128xf32>
    %c4_32 = arith.constant 4 : index
    %c0_33 = arith.constant 0 : index
    %c0_34 = arith.constant 0 : index
    %40 = vector.load %arg3[%c4_32, %c0_33, %c0_34] : memref<8x1x128xf32, #tpu.memory_space<vmem>>, vector<1x1x128xf32>
    %41 = vector.shape_cast %40 : vector<1x1x128xf32> to vector<1x128xf32>
    %42 = vector.broadcast %41 : vector<1x128xf32> to vector<256x128xf32>
    %43 = arith.addf %39, %42 : vector<256x128xf32>
    %cst_35 = arith.constant 0.000000e+00 : f32
    %44 = vector.broadcast %cst_35 : f32 to vector<256x128xf32>
    %45 = arith.maximumf %43, %44 : vector<256x128xf32>
    %c5 = arith.constant 5 : index
    %c0_36 = arith.constant 0 : index
    %c0_37 = arith.constant 0 : index
    %46 = vector.load %arg2[%c5, %c0_36, %c0_37] : memref<8x128x128xf32, #tpu.memory_space<vmem>>, vector<1x128x128xf32>
    %47 = vector.shape_cast %46 : vector<1x128x128xf32> to vector<128x128xf32>
    %cst_38 = arith.constant dense<0.000000e+00> : vector<256x128xf32>
    %48 = tpu.matmul %45, %47, %cst_38 {dimension_numbers = #tpu.dot_dimension_numbers<[1], [0], [0], [1], [0, 0, 1, 1], [], []>} : vector<256x128xf32>, vector<128x128xf32>, vector<256x128xf32> -> vector<256x128xf32>
    %c5_39 = arith.constant 5 : index
    %c0_40 = arith.constant 0 : index
    %c0_41 = arith.constant 0 : index
    %49 = vector.load %arg3[%c5_39, %c0_40, %c0_41] : memref<8x1x128xf32, #tpu.memory_space<vmem>>, vector<1x1x128xf32>
    %50 = vector.shape_cast %49 : vector<1x1x128xf32> to vector<1x128xf32>
    %51 = vector.broadcast %50 : vector<1x128xf32> to vector<256x128xf32>
    %52 = arith.addf %48, %51 : vector<256x128xf32>
    %cst_42 = arith.constant 0.000000e+00 : f32
    %53 = vector.broadcast %cst_42 : f32 to vector<256x128xf32>
    %54 = arith.maximumf %52, %53 : vector<256x128xf32>
    %c6 = arith.constant 6 : index
    %c0_43 = arith.constant 0 : index
    %c0_44 = arith.constant 0 : index
    %55 = vector.load %arg2[%c6, %c0_43, %c0_44] : memref<8x128x128xf32, #tpu.memory_space<vmem>>, vector<1x128x128xf32>
    %56 = vector.shape_cast %55 : vector<1x128x128xf32> to vector<128x128xf32>
    %cst_45 = arith.constant dense<0.000000e+00> : vector<256x128xf32>
    %57 = tpu.matmul %54, %56, %cst_45 {dimension_numbers = #tpu.dot_dimension_numbers<[1], [0], [0], [1], [0, 0, 1, 1], [], []>} : vector<256x128xf32>, vector<128x128xf32>, vector<256x128xf32> -> vector<256x128xf32>
    %c6_46 = arith.constant 6 : index
    %c0_47 = arith.constant 0 : index
    %c0_48 = arith.constant 0 : index
    %58 = vector.load %arg3[%c6_46, %c0_47, %c0_48] : memref<8x1x128xf32, #tpu.memory_space<vmem>>, vector<1x1x128xf32>
    %59 = vector.shape_cast %58 : vector<1x1x128xf32> to vector<1x128xf32>
    %60 = vector.broadcast %59 : vector<1x128xf32> to vector<256x128xf32>
    %61 = arith.addf %57, %60 : vector<256x128xf32>
    %cst_49 = arith.constant 0.000000e+00 : f32
    %62 = vector.broadcast %cst_49 : f32 to vector<256x128xf32>
    %63 = arith.maximumf %61, %62 : vector<256x128xf32>
    %c7 = arith.constant 7 : index
    %c0_50 = arith.constant 0 : index
    %c0_51 = arith.constant 0 : index
    %64 = vector.load %arg2[%c7, %c0_50, %c0_51] : memref<8x128x128xf32, #tpu.memory_space<vmem>>, vector<1x128x128xf32>
    %65 = vector.shape_cast %64 : vector<1x128x128xf32> to vector<128x128xf32>
    %cst_52 = arith.constant dense<0.000000e+00> : vector<256x128xf32>
    %66 = tpu.matmul %63, %65, %cst_52 {dimension_numbers = #tpu.dot_dimension_numbers<[1], [0], [0], [1], [0, 0, 1, 1], [], []>} : vector<256x128xf32>, vector<128x128xf32>, vector<256x128xf32> -> vector<256x128xf32>
    %c7_53 = arith.constant 7 : index
    %c0_54 = arith.constant 0 : index
    %c0_55 = arith.constant 0 : index
    %67 = vector.load %arg3[%c7_53, %c0_54, %c0_55] : memref<8x1x128xf32, #tpu.memory_space<vmem>>, vector<1x1x128xf32>
    %68 = vector.shape_cast %67 : vector<1x1x128xf32> to vector<1x128xf32>
    %69 = vector.broadcast %68 : vector<1x128xf32> to vector<256x128xf32>
    %70 = arith.addf %66, %69 : vector<256x128xf32>
    %c0_56 = arith.constant 0 : index
    %c0_57 = arith.constant 0 : index
    %71 = vector.load %arg4[%c0_56, %c0_57] : memref<256x128xf32, #tpu.memory_space<vmem>>, vector<256x128xf32>
    tpu.vector_store %arg4[%c0_56, %c0_57], %70 {strides = array<i32>} : memref<256x128xf32, #tpu.memory_space<vmem>>, vector<256x128xf32>,
    return
  }
  func.func @transform_0(%arg0: i32) -> (i32, i32) {
    %c0_i32 = arith.constant 0 : i32
    %c0_i32_0 = arith.constant 0 : i32
    return %arg0, %c0_i32 : i32, i32
  }
  func.func @transform_1(%arg0: i32) -> (i32, i32, i32) {
    %c0_i32 = arith.constant 0 : i32
    %c0_i32_0 = arith.constant 0 : i32
    %c0_i32_1 = arith.constant 0 : i32
    %c0_i32_2 = arith.constant 0 : i32
    return %c0_i32, %c0_i32_0, %c0_i32_1 : i32, i32, i32
  }
  func.func @transform_2(%arg0: i32) -> (i32, i32, i32) {
    %c0_i32 = arith.constant 0 : i32
    %c0_i32_0 = arith.constant 0 : i32
    %c0_i32_1 = arith.constant 0 : i32
    %c0_i32_2 = arith.constant 0 : i32
    return %c0_i32, %c0_i32_0, %c0_i32_1 : i32, i32, i32
  }
  func.func @transform_3(%arg0: i32) -> (i32, i32) {
    %c0_i32 = arith.constant 0 : i32
    %c0_i32_0 = arith.constant 0 : i32
    return %arg0, %c0_i32 : i32, i32
  }
}

</mosaic_0001>

<bundles_post_ra>
// kernel: tpu_custom_call.1
= control target key start
LH: loop header
LB: loop body
LE: loop exit
PB: predicated region body
PF: predicated region fallthrough
CT: control target
= control target key end

     0   :  { %8 = vsyncpa [#allocation3], 0  ;;  %s4114_s0 = inlined_call_operand.hbm [shape: f32[256,128], index: 0, kind: input, shape index: {}]   ;;  %s4115_s1 = inlined_call_operand.hbm [shape: f32[8,128,128], index: 1, kind: input, shape index: {}]   ;;  %s4116_s2 = inlined_call_operand.hbm [shape: f32[8,1,128], index: 2, kind: input, shape index: {}]   ;;  %s4117_s3 = inlined_call_operand.hbm [shape: f32[256,128], index: 3, kind: output, shape index: {}]  }
   0x1   :  { %9 = vsyncpa [#allocation6], 0 }
   0x2   :  { %10 = vsyncpa [#allocation4], 0  ;;  %s3750_s12 = smov [#allocation5]   ;;  %s3751_s14 = smov [#allocation2]  }
   0x3   :  { %s28_s13 = sshll.u32 %s3750_s12, 4  ;;  %s16_s15 = sshll.u32 %s3751_s14, 4  ;;  %s29_s13 = int_to_ptr.vmem [resolvable:$true] %s28_s13  ;;  %s3778_s15 = int_to_ptr.vmem [resolvable:$true] %s16_s15 }
   0x4   :  { %s3656_s18 = scalar_lea.hbm %s4115_s1, 16384 }
   0x5   :  { %p3657_p0 = scmp.ne.s32.totalorder %s4115_s1, %s3656_s18  ;;  %p3660_p1 = scmp.lt.u32.totalorder %s3656_s18, %s4115_s1 }
   0x7   :  { %p3662_p2 = pnand %p3660_p1, %p3657_p0 }
   0x9   :  { %3665 = shalt.err (!%p3662_p2)
}
   0xa   :  { %s3666_s23 = scalar_lea.vmem %s29_s13, 16384  ;;  %p3671_p4 = scmp.lt.s32.totalorder %s29_s13, %s29_s13 }
   0xb   :  { %p3667_p3 = scmp.ne.s32.totalorder %s29_s13, %s3666_s23  ;;  %p3672_p5 = scmp.lt.s32.totalorder %s3666_s23, %s3666_s23 }
   0xd   :  { %p3673_p6 = por %p3672_p5, %p3671_p4 }
   0xf   :  { %p3674_p7 = pnand %p3673_p6, %p3667_p3 }
  0x11   :  { %3677 = shalt.err (!%p3674_p7)
}
  0x12   :  { %s3752_s24 = smov 128   ;;  %s3753_s25 = smov 8  }
  0x13   :  { %34 = dma.hbm_to_vmem [thread:$0]  %s4115_s1, 16384, %s29_s13, [#allocation6], %s3752_s24, %s3752_s24, %s3753_s25  }
  0x14   :  { %s3678_s30 = scalar_lea.hbm %s4114_s0, 4096 }
  0x15   :  { %p3679_p8 = scmp.ne.s32.totalorder %s4114_s0, %s3678_s30  ;;  %p3682_p9 = scmp.lt.u32.totalorder %s3678_s30, %s4114_s0 }
  0x17   :  { %p3684_p10 = pnand %p3682_p9, %p3679_p8 }
  0x19   :  { %3687 = shalt.err (!%p3684_p10)
}
  0x1a   :  { %s3688_s8 = scalar_lea.vmem %s3778_s15, 4096  ;;  %p3693_p12 = scmp.lt.s32.totalorder %s3778_s15, %s3778_s15 }
  0x1b   :  { %p3689_p11 = scmp.ne.s32.totalorder %s3778_s15, %s3688_s8  ;;  %p3694_p13 = scmp.lt.s32.totalorder %s3688_s8, %s3688_s8 }
  0x1d   :  { %p3695_p0 = por %p3694_p13, %p3693_p12 }
  0x1f   :  { %p3696_p1 = pnand %p3695_p0, %p3689_p11 }
  0x21   :  { %3699 = shalt.err (!%p3696_p1)
}
  0x22   :  { %22 = dma.hbm_to_vmem [thread:$0]  %s4114_s0, 4096, %s3778_s15, [#allocation3], %s3752_s24, %s3752_s24, %s3753_s25  }
  0x23   :  { %s3754_s10 = smov [#allocation7]   ;;  %s3700_s14 = scalar_lea.hbm %s4116_s2, 128 }
  0x24   :  { %s40_s11 = sshll.u32 %s3754_s10, 4  ;;  %p3701_p2 = scmp.ne.s32.totalorder %s4116_s2, %s3700_s14  ;;  %s41_s11 = int_to_ptr.vmem [resolvable:$true] %s40_s11 }
  0x25   :  { %p3704_p3 = scmp.lt.u32.totalorder %s3700_s14, %s4116_s2 }
  0x27   :  { %p3706_p4 = pnand %p3704_p3, %p3701_p2 }
  0x29   :  { %3709 = shalt.err (!%p3706_p4)
}
  0x2a   :  { %s3710_s20 = scalar_lea.vmem %s41_s11, 128  ;;  %p3715_p6 = scmp.lt.s32.totalorder %s41_s11, %s41_s11 }
  0x2b   :  { %p3711_p5 = scmp.ne.s32.totalorder %s41_s11, %s3710_s20  ;;  %p3716_p7 = scmp.lt.s32.totalorder %s3710_s20, %s3710_s20 }
  0x2d   :  { %p3717_p8 = por %p3716_p7, %p3715_p6 }
  0x2f   :  { %p3718_p9 = pnand %p3717_p8, %p3711_p5 }
  0x31   :  { %3721 = shalt.err (!%p3718_p9)
}
  0x32   :  { %s3755_s0 = smov 16   ;;  %s3756_s15 = smov 1  }
  0x33   :  { %46 = dma.hbm_to_vmem [thread:$0]  %s4116_s2, 128, %s41_s11, [#allocation6], %s3755_s0, %s3755_s0, %s3756_s15  }
  0x34   :  { %3744 = dma.done.wait [#allocation3], 4096  }
  0x35   :  { %3745 = vsyncadd [#allocation3], 4294963200 }
  0x36   :  { %3746 = dma.done.wait [#allocation6], 16512  }
  0x37   :  { %3747 = vsyncadd [#allocation6], 4294950784  ;;  %v88_v0 = vld [vmem:[#allocation5] sm:$0xff]  ;;  %v89_v1 = vld [vmem:[#allocation5 + $0x8] sm:$0xff]  ;;  %s3757_s2 = smov [#allocation8]  }
  0x38   :  { %v90_v2 = vld [vmem:[#allocation5 + $0x10] sm:$0xff]  ;;  %v3392_v3 = vpack.c.bf16 %v89_v1, %v88_v0  ;;  %v91_v4 = vld [vmem:[#allocation5 + $0x18] sm:$0xff]  ;;  %v92_v6 = vld [vmem:[#allocation5 + $0x20] sm:$0xff]  ;;  %s2347_s23 = sshll.u32 %s3757_s2, 4  ;;  %s2348_s23 = int_to_ptr.vmem [resolvable:$true] %s2347_s23 }
  0x39   :  { %v3396_v5 = vpack.c.bf16 %v91_v4, %v90_v2  ;;  %v93_v7 = vld [vmem:[#allocation5 + $0x28] sm:$0xff]  ;;  %v56_v9 = vld [vmem:[#allocation2] sm:$0xff]  ;;  %v94_v10 = vld [vmem:[#allocation5 + $0x30] sm:$0xff]  ;;  %s3722_s26 = scalar_lea.vmem %s2348_s23, 4096  ;;  %p3727_p11 = scmp.lt.s32.totalorder %s2348_s23, %s2348_s23 }
  0x3a   :  { %3393 = vmatprep.subr.bf16.mxu0 %v3392_v3  ;;  %v3400_v8 = vpack.c.bf16 %v93_v7, %v92_v6  ;;  %v95_v11 = vld [vmem:[#allocation5 + $0x38] sm:$0xff]  ;;  %2784 = vmatprep.mubr.f32.mxu0 %v56_v9  ;;  %v96_v13 = vld [vmem:[#allocation5 + $0x40] sm:$0xff]  ;;  %v97_v14 = vld [vmem:[#allocation5 + $0x48] sm:$0xff]  ;;  %p3723_p10 = scmp.ne.s32.totalorder %s2348_s23, %s3722_s26  ;;  %p3728_p12 = scmp.lt.s32.totalorder %s3722_s26, %s3722_s26 }
  0x3b   :  { %3395 = vmatpush3.bf16.msra.mxu0 %v3392_v3  ;;  %v3404_v12 = vpack.c.bf16 %v95_v11, %v94_v10  ;;  %v3408_v15 = vpack.c.bf16 %v97_v14, %v96_v13  ;;  %v98_v16 = vld [vmem:[#allocation5 + $0x50] sm:$0xff]  ;;  %v99_v17 = vld [vmem:[#allocation5 + $0x58] sm:$0xff]  ;;  %v369_v18 = vld [vmem:[#allocation5 + $0x80] sm:$0xff] }
  0x3c   :  { %3397 = vmatprep.subr.bf16.mxu0 %v3396_v5  ;;  %v370_v19 = vld [vmem:[#allocation5 + $0x88] sm:$0xff]  ;;  %v371_v20 = vld [vmem:[#allocation5 + $0x90] sm:$0xff]  ;;  %v3412_v21 = vpack.c.bf16 %v99_v17, %v98_v16  ;;  %v100_v22 = vld [vmem:[#allocation5 + $0x60] sm:$0xff]  ;;  %p3729_p13 = por %p3728_p12, %p3727_p11 }
  0x3d   :  { %v3424_v23 = vpack.c.bf16 %v370_v19, %v369_v18  ;;  %v372_v24 = vld [vmem:[#allocation5 + $0x98] sm:$0xff]  ;;  %v101_v25 = vld [vmem:[#allocation5 + $0x68] sm:$0xff]  ;;  %v373_v27 = vld [vmem:[#allocation5 + $0xa0] sm:$0xff] }
  0x3e   :  { %v3428_v26 = vpack.c.bf16 %v372_v24, %v371_v20  ;;  %v374_v28 = vld [vmem:[#allocation5 + $0xa8] sm:$0xff]  ;;  %v3416_v29 = vpack.c.bf16 %v101_v25, %v100_v22  ;;  %v102_v30 = vld [vmem:[#allocation5 + $0x70] sm:$0xff]  ;;  %v103_v32 = vld [vmem:[#allocation5 + $0x78] sm:$0xff]  ;;  %p3730_p0 = pnand %p3729_p13, %p3723_p10 }
  0x3f   :  { %3399 = vmatpush3.bf16.msra.mxu0 %v3396_v5  ;;  %3425 = vmatprep.subr.bf16.mxu1 %v3424_v23  ;;  %v3432_v31 = vpack.c.bf16 %v374_v28, %v373_v27  ;;  %v375_v33 = vld [vmem:[#allocation5 + $0xb0] sm:$0xff]  ;;  %v376_v34 = vld [vmem:[#allocation5 + $0xb8] sm:$0xff]  ;;  %v3420_v35 = vpack.c.bf16 %v103_v32, %v102_v30  ;;  %v377_v37 = vld [vmem:[#allocation5 + $0xc0] sm:$0xff] }
  0x40   :  { %3401 = vmatprep.subr.bf16.mxu0 %v3400_v8  ;;  %3427 = vmatpush3.bf16.msra.mxu1 %v3424_v23  ;;  %v3436_v36 = vpack.c.bf16 %v376_v34, %v375_v33  ;;  %v378_v38 = vld [vmem:[#allocation5 + $0xc8] sm:$0xff]  ;;  %v379_v40 = vld [vmem:[#allocation5 + $0xd0] sm:$0xff]  ;;  %v380_v41 = vld [vmem:[#allocation5 + $0xd8] sm:$0xff] }
  0x41   :  { %3429 = vmatprep.subr.bf16.mxu1 %v3428_v26  ;;  %v3440_v39 = vpack.c.bf16 %v378_v38, %v377_v37  ;;  %v57_v42 = vld [vmem:[#allocation2 + $0x8] sm:$0xff]  ;;  %v58_v43 = vld [vmem:[#allocation2 + $0x10] sm:$0xff]  ;;  %v3444_v44 = vpack.c.bf16 %v380_v41, %v379_v40  ;;  %v381_v45 = vld [vmem:[#allocation5 + $0xe0] sm:$0xff] }
  0x42   :  { %v382_v46 = vld [vmem:[#allocation5 + $0xe8] sm:$0xff]  ;;  %v59_v47 = vld [vmem:[#allocation2 + $0x18] sm:$0xff]  ;;  %v60_v48 = vld [vmem:[#allocation2 + $0x20] sm:$0xff] }
  0x43   :  { %3403 = vmatpush3.bf16.msra.mxu0 %v3400_v8  ;;  %v3448_v49 = vpack.c.bf16 %v382_v46, %v381_v45  ;;  %v61_v50 = vld [vmem:[#allocation2 + $0x28] sm:$0xff]  ;;  %v62_v51 = vld [vmem:[#allocation2 + $0x30] sm:$0xff]  ;;  %v63_v52 = vld [vmem:[#allocation2 + $0x38] sm:$0xff] }
  0x44   :  { %3405 = vmatprep.subr.bf16.mxu0 %v3404_v12  ;;  %3431 = vmatpush3.bf16.msra.mxu1 %v3428_v26  ;;  %v64_v53 = vld [vmem:[#allocation2 + $0x40] sm:$0xff]  ;;  %v65_v54 = vld [vmem:[#allocation2 + $0x48] sm:$0xff]  ;;  %v66_v55 = vld [vmem:[#allocation2 + $0x50] sm:$0xff] }
  0x45   :  { %3433 = vmatprep.subr.bf16.mxu1 %v3432_v31  ;;  %v67_v56 = vld [vmem:[#allocation2 + $0x58] sm:$0xff]  ;;  %v68_v57 = vld [vmem:[#allocation2 + $0x60] sm:$0xff]  ;;  %v69_v58 = vld [vmem:[#allocation2 + $0x68] sm:$0xff] }
  0x46   :  { %v70_v59 = vld [vmem:[#allocation2 + $0x70] sm:$0xff]  ;;  %v71_v60 = vld [vmem:[#allocation2 + $0x78] sm:$0xff]  ;;  %v72_v61 = vld [vmem:[#allocation2 + $0x80] sm:$0xff] }
  0x47   :  { %3407 = vmatpush3.bf16.msra.mxu0 %v3404_v12  ;;  %v73_v62 = vld [vmem:[#allocation2 + $0x88] sm:$0xff]  ;;  %v74_v63 = vld [vmem:[#allocation2 + $0x90] sm:$0xff]  ;;  %v75_v0 = vld [vmem:[#allocation2 + $0x98] sm:$0xff] }
  0x48   :  { %3409 = vmatprep.subr.bf16.mxu0 %v3408_v15  ;;  %3435 = vmatpush3.bf16.msra.mxu1 %v3432_v31  ;;  %v76_v1 = vld [vmem:[#allocation2 + $0xa0] sm:$0xff]  ;;  %v77_v2 = vld [vmem:[#allocation2 + $0xa8] sm:$0xff]  ;;  %v78_v3 = vld [vmem:[#allocation2 + $0xb0] sm:$0xff] }
  0x49   :  { %3437 = vmatprep.subr.bf16.mxu1 %v3436_v36  ;;  %v79_v4 = vld [vmem:[#allocation2 + $0xb8] sm:$0xff]  ;;  %v80_v5 = vld [vmem:[#allocation2 + $0xc0] sm:$0xff]  ;;  %v81_v6 = vld [vmem:[#allocation2 + $0xc8] sm:$0xff] }
  0x4a   :  { %v82_v7 = vld [vmem:[#allocation2 + $0xd0] sm:$0xff]  ;;  %v83_v8 = vld [vmem:[#allocation2 + $0xd8] sm:$0xff]  ;;  %v84_v9 = vld [vmem:[#allocation2 + $0xe0] sm:$0xff] }
  0x4b   :  { %3411 = vmatpush3.bf16.msra.mxu0 %v3408_v15  ;;  %v85_v10 = vld [vmem:[#allocation2 + $0xe8] sm:$0xff]  ;;  %v86_v11 = vld [vmem:[#allocation2 + $0xf0] sm:$0xff]  ;;  %v87_v12 = vld [vmem:[#allocation2 + $0xf8] sm:$0xff] }
  0x4c   :  { %3413 = vmatprep.subr.bf16.mxu0 %v3412_v21  ;;  %3439 = vmatpush3.bf16.msra.mxu1 %v3436_v36  ;;  %v383_v13 = vld [vmem:[#allocation5 + $0xf0] sm:$0xff]  ;;  %v384_v14 = vld [vmem:[#allocation5 + $0xf8] sm:$0xff]  ;;  %v651_v16 = vld [vmem:[#allocation5 + $0x100] sm:$0xff] }
  0x4d   :  { %3441 = vmatprep.subr.bf16.mxu1 %v3440_v39  ;;  %v3452_v15 = vpack.c.bf16 %v384_v14, %v383_v13  ;;  %v652_v17 = vld [vmem:[#allocation5 + $0x108] sm:$0xff]  ;;  %v653_v18 = vld [vmem:[#allocation5 + $0x110] sm:$0xff]  ;;  %v654_v20 = vld [vmem:[#allocation5 + $0x118] sm:$0xff] }
  0x4e   :  { %v3456_v19 = vpack.c.bf16 %v652_v17, %v651_v16  ;;  %v655_v22 = vld [vmem:[#allocation5 + $0x120] sm:$0xff]  ;;  %v656_v23 = vld [vmem:[#allocation5 + $0x128] sm:$0xff]  ;;  %v657_v25 = vld [vmem:[#allocation5 + $0x130] sm:$0xff] }
  0x4f   :  { %3415 = vmatpush3.bf16.msra.mxu0 %v3412_v21  ;;  %v3460_v21 = vpack.c.bf16 %v654_v20, %v653_v18  ;;  %v3464_v24 = vpack.c.bf16 %v656_v23, %v655_v22  ;;  %v658_v26 = vld [vmem:[#allocation5 + $0x138] sm:$0xff]  ;;  %v659_v28 = vld [vmem:[#allocation5 + $0x140] sm:$0xff]  ;;  %v661_v31 = vld [vmem:[#allocation5 + $0x150] sm:$0xff] }
  0x50   :  { %3417 = vmatprep.subr.bf16.mxu0 %v3416_v29  ;;  %3443 = vmatpush3.bf16.msra.mxu1 %v3440_v39  ;;  %v3468_v27 = vpack.c.bf16 %v658_v26, %v657_v25  ;;  %v662_v32 = vld [vmem:[#allocation5 + $0x158] sm:$0xff]  ;;  %v663_v34 = vld [vmem:[#allocation5 + $0x160] sm:$0xff]  ;;  %v665_v37 = vld [vmem:[#allocation5 + $0x170] sm:$0xff] }
  0x51   :  { %3445 = vmatprep.subr.bf16.mxu1 %v3444_v44  ;;  %v3476_v33 = vpack.c.bf16 %v662_v32, %v661_v31  ;;  %v666_v38 = vld [vmem:[#allocation5 + $0x178] sm:$0xff]  ;;  %v3827_v40 = vld [vmem:[#allocation7] ss:$0 sm:$0xff] }
  0x52   :  { %v3484_v39 = vpack.c.bf16 %v666_v38, %v665_v37 }
  0x53   :  { %3419 = vmatpush3.bf16.msra.mxu0 %v3416_v29  ;;  %v660_v29 = vld [vmem:[#allocation5 + $0x148] sm:$0xff] }
  0x54   :  { %3421 = vmatprep.subr.bf16.mxu0 %v3420_v35  ;;  %3447 = vmatpush3.bf16.msra.mxu1 %v3444_v44  ;;  %v3472_v30 = vpack.c.bf16 %v660_v29, %v659_v28 }
  0x55   :  { %3449 = vmatprep.subr.bf16.mxu1 %v3448_v49 }
  0x57   :  { %3423 = vmatpush3.bf16.msra.mxu0 %v3420_v35  ;;  %v664_v35 = vld [vmem:[#allocation5 + $0x168] sm:$0xff] }
  0x58   :  { %3451 = vmatpush3.bf16.msra.mxu1 %v3448_v49  ;;  %3457 = vmatprep.subr.bf16.mxu0 %v3456_v19  ;;  %v3480_v36 = vpack.c.bf16 %v664_v35, %v663_v34 }
  0x59   :  { %3453 = vmatprep.subr.bf16.mxu1 %v3452_v15 }
  0x5a   :  { %2785 = vmatmul.mubr.f32.vlgmr.msra.gmra.mrb[0].mxu0 %v57_v42 }
  0x5b   :  { %2787 = vmatprep.mubr.f32.mxu0 %v58_v43  ;;  %3459 = vmatpush3.bf16.msra.mxu0 %v3456_v19 }
  0x5c   :  { %3455 = vmatpush3.bf16.msra.mxu1 %v3452_v15  ;;  %3461 = vmatprep.subr.bf16.mxu0 %v3460_v21 }
  0x5e   :  { %2788 = vmatmul.mubr.f32.gmra.mrb[2].mxu0 %v59_v47 }
  0x5f   :  { %2790 = vmatprep.mubr.f32.mxu0 %v60_v48  ;;  %3463 = vmatpush3.bf16.msra.mxu0 %v3460_v21 }
  0x60   :  { %3465 = vmatprep.subr.bf16.mxu0 %v3464_v24 }
  0x62   :  { %2791 = vmatmul.mubr.f32.gmra.mrb[4].mxu0 %v61_v50 }
  0x63   :  { %2793 = vmatprep.mubr.f32.mxu0 %v62_v51  ;;  %3467 = vmatpush3.bf16.msra.mxu0 %v3464_v24 }
  0x64   :  { %3469 = vmatprep.subr.bf16.mxu0 %v3468_v27 }
  0x66   :  { %2794 = vmatmul.mubr.f32.gmra.mrb[6].mxu0 %v63_v52 }
  0x67   :  { %2796 = vmatprep.mubr.f32.mxu0 %v64_v53  ;;  %3471 = vmatpush3.bf16.msra.mxu0 %v3468_v27 }
  0x68   :  { %3473 = vmatprep.subr.bf16.mxu0 %v3472_v30 }
  0x6a   :  { %2797 = vmatmul.mubr.f32.gmra.mrb[8].mxu0 %v65_v54 }
  0x6b   :  { %2799 = vmatprep.mubr.f32.mxu0 %v66_v55  ;;  %3475 = vmatpush3.bf16.msra.mxu0 %v3472_v30 }
  0x6c   :  { %3477 = vmatprep.subr.bf16.mxu0 %v3476_v33 }
  0x6e   :  { %2800 = vmatmul.mubr.f32.gmra.mrb[10].mxu0 %v67_v56 }
  0x6f   :  { %2802 = vmatprep.mubr.f32.mxu0 %v68_v57  ;;  %3479 = vmatpush3.bf16.msra.mxu0 %v3476_v33 }
  0x70   :  { %3481 = vmatprep.subr.bf16.mxu0 %v3480_v36 }
  0x72   :  { %2803 = vmatmul.mubr.f32.gmra.mrb[12].mxu0 %v69_v58 }
  0x73   :  { %2805 = vmatprep.mubr.f32.mxu0 %v70_v59  ;;  %3483 = vmatpush3.bf16.msra.mxu0 %v3480_v36 }
  0x74   :  { %3485 = vmatprep.subr.bf16.mxu0 %v3484_v39 }
  0x76   :  { %2806 = vmatmul.mubr.f32.gmra.mrb[14].mxu0 %v71_v60 }
  0x77   :  { %2808 = vmatprep.mubr.f32.mxu0 %v72_v61  ;;  %3487 = vmatpush3.bf16.msra.mxu0 %v3484_v39 }
  0x7a   :  { %2809 = vmatmul.mubr.f32.gmra.mrb[16].mxu0 %v73_v62 }
  0x7b   :  { %2811 = vmatprep.mubr.f32.mxu0 %v74_v63 }
  0x7e   :  { %2812 = vmatmul.mubr.f32.gmra.mrb[18].mxu0 %v75_v0 }
  0x7f   :  { %2814 = vmatprep.mubr.f32.mxu0 %v76_v1 }
  0x82   :  { %2815 = vmatmul.mubr.f32.gmra.mrb[20].mxu0 %v77_v2 }
  0x83   :  { %2817 = vmatprep.mubr.f32.mxu0 %v78_v3 }
  0x86   :  { %2818 = vmatmul.mubr.f32.gmra.mrb[22].mxu0 %v79_v4 }
  0x87   :  { %2820 = vmatprep.mubr.f32.mxu0 %v80_v5 }
  0x8a   :  { %2821 = vmatmul.mubr.f32.gmra.mrb[24].mxu0 %v81_v6 }
  0x8b   :  { %2823 = vmatprep.mubr.f32.mxu0 %v82_v7 }
  0x8e   :  { %2824 = vmatmul.mubr.f32.gmra.mrb[26].mxu0 %v83_v8 }
  0x8f   :  { %2826 = vmatprep.mubr.f32.mxu0 %v84_v9 }
  0x92   :  { %2827 = vmatmul.mubr.f32.gmra.mrb[28].mxu0 %v85_v10 }
  0x93   :  { %2829 = vmatprep.mubr.f32.mxu0 %v86_v11 }
  0x96   :  { %2830 = vmatmul.mubr.f32.gmra.mrb[30].mxu0 %v87_v12 }
 0x12d   :  { %v2786_v41 = vpop.f32.mrb[0].mxu0 }
 0x12e   :  { %v183_v42 = vadd.f32 %v2786_v41, %v3827_v40  ;;  %v177_v43 = vpop.f32.mrb[1].mxu0 }
 0x12f   :  { %v178_v44 = vadd.f32 %v3827_v40, %v177_v43 }
 0x130   :  { %v337_v47 = vmax.f32 %v183_v42, 0.0 }
 0x131   :  { %v2789_v45 = vpop.f32.mrb[2].mxu0  ;;  %v336_v46 = vmax.f32 %v178_v44, 0.0 }
 0x132   :  { %v193_v48 = vadd.f32 %v2789_v45, %v3827_v40  ;;  %v187_v49 = vpop.f32.mrb[3].mxu0 }
 0x133   :  { %v188_v50 = vadd.f32 %v3827_v40, %v187_v49  ;;  %2864 = vmatprep.mubr.f32.mxu1 %v336_v46 }
 0x134   :  { %2865 = vmatmul.mubr.f32.vlgmr.msra.gmra.mrb[0].mxu1 %v337_v47  ;;  %v339_v53 = vmax.f32 %v193_v48, 0.0 }
 0x135   :  { %v338_v51 = vmax.f32 %v188_v50, 0.0  ;;  %v2792_v52 = vpop.f32.mrb[4].mxu0 }
 0x136   :  { %v203_v54 = vadd.f32 %v2792_v52, %v3827_v40  ;;  %v197_v55 = vpop.f32.mrb[5].mxu0 }
 0x137   :  { %v198_v56 = vadd.f32 %v3827_v40, %v197_v55  ;;  %2867 = vmatprep.mubr.f32.mxu1 %v338_v51 }
 0x138   :  { %2868 = vmatmul.mubr.f32.gmra.mrb[2].mxu1 %v339_v53  ;;  %v341_v59 = vmax.f32 %v203_v54, 0.0 }
 0x139   :  { %v340_v57 = vmax.f32 %v198_v56, 0.0  ;;  %v2795_v58 = vpop.f32.mrb[6].mxu0 }
 0x13a   :  { %v213_v60 = vadd.f32 %v2795_v58, %v3827_v40  ;;  %v207_v61 = vpop.f32.mrb[7].mxu0 }
 0x13b   :  { %v208_v62 = vadd.f32 %v3827_v40, %v207_v61  ;;  %2870 = vmatprep.mubr.f32.mxu1 %v340_v57 }
 0x13c   :  { %2871 = vmatmul.mubr.f32.gmra.mrb[4].mxu1 %v341_v59  ;;  %v343_v1 = vmax.f32 %v213_v60, 0.0 }
 0x13d   :  { %v342_v63 = vmax.f32 %v208_v62, 0.0  ;;  %v2798_v0 = vpop.f32.mrb[8].mxu0 }
 0x13e   :  { %v223_v2 = vadd.f32 %v2798_v0, %v3827_v40  ;;  %v217_v3 = vpop.f32.mrb[9].mxu0 }
 0x13f   :  { %v218_v4 = vadd.f32 %v3827_v40, %v217_v3  ;;  %2873 = vmatprep.mubr.f32.mxu1 %v342_v63 }
 0x140   :  { %2874 = vmatmul.mubr.f32.gmra.mrb[6].mxu1 %v343_v1  ;;  %v345_v7 = vmax.f32 %v223_v2, 0.0 }
 0x141   :  { %v344_v5 = vmax.f32 %v218_v4, 0.0  ;;  %v2801_v6 = vpop.f32.mrb[10].mxu0 }
 0x142   :  { %v233_v8 = vadd.f32 %v2801_v6, %v3827_v40  ;;  %v227_v9 = vpop.f32.mrb[11].mxu0 }
 0x143   :  { %v228_v10 = vadd.f32 %v3827_v40, %v227_v9  ;;  %2876 = vmatprep.mubr.f32.mxu1 %v344_v5 }
 0x144   :  { %2877 = vmatmul.mubr.f32.gmra.mrb[8].mxu1 %v345_v7  ;;  %v347_v13 = vmax.f32 %v233_v8, 0.0 }
 0x145   :  { %v346_v11 = vmax.f32 %v228_v10, 0.0  ;;  %v2804_v12 = vpop.f32.mrb[12].mxu0  ;;  %v933_v10 = vld [vmem:[#allocation5 + $0x180] sm:$0xff] }
 0x146   :  { %v243_v14 = vadd.f32 %v2804_v12, %v3827_v40  ;;  %v237_v15 = vpop.f32.mrb[13].mxu0  ;;  %v935_v12 = vld [vmem:[#allocation5 + $0x190] sm:$0xff] }
 0x147   :  { %v238_v16 = vadd.f32 %v3827_v40, %v237_v15  ;;  %2879 = vmatprep.mubr.f32.mxu1 %v346_v11  ;;  %v934_v11 = vld [vmem:[#allocation5 + $0x188] sm:$0xff] }
 0x148   :  { %2880 = vmatmul.mubr.f32.gmra.mrb[10].mxu1 %v347_v13  ;;  %v349_v19 = vmax.f32 %v243_v14, 0.0  ;;  %v3488_v13 = vpack.c.bf16 %v934_v11, %v933_v10  ;;  %v936_v14 = vld [vmem:[#allocation5 + $0x198] sm:$0xff] }
 0x149   :  { %v348_v17 = vmax.f32 %v238_v16, 0.0  ;;  %v2807_v18 = vpop.f32.mrb[14].mxu0  ;;  %v3492_v15 = vpack.c.bf16 %v936_v14, %v935_v12  ;;  %v937_v16 = vld [vmem:[#allocation5 + $0x1a0] sm:$0xff] }
 0x14a   :  { %v253_v20 = vadd.f32 %v2807_v18, %v3827_v40  ;;  %v247_v21 = vpop.f32.mrb[15].mxu0  ;;  %3489 = vmatprep.subr.bf16.mxu1 %v3488_v13 }
 0x14b   :  { %v248_v22 = vadd.f32 %v3827_v40, %v247_v21  ;;  %2882 = vmatprep.mubr.f32.mxu1 %v348_v17  ;;  %v938_v17 = vld [vmem:[#allocation5 + $0x1a8] sm:$0xff]  ;;  %3491 = vmatpush3.bf16.msra.mxu1 %v3488_v13  ;;  %v941_v21 = vld [vmem:[#allocation5 + $0x1c0] sm:$0xff] }
 0x14c   :  { %2883 = vmatmul.mubr.f32.gmra.mrb[12].mxu1 %v349_v19  ;;  %v351_v25 = vmax.f32 %v253_v20, 0.0  ;;  %3493 = vmatprep.subr.bf16.mxu1 %v3492_v15  ;;  %v3496_v18 = vpack.c.bf16 %v938_v17, %v937_v16  ;;  %v939_v19 = vld [vmem:[#allocation5 + $0x1b0] sm:$0xff] }
 0x14d   :  { %v350_v23 = vmax.f32 %v248_v22, 0.0  ;;  %v2810_v24 = vpop.f32.mrb[16].mxu0  ;;  %v942_v22 = vld [vmem:[#allocation5 + $0x1c8] sm:$0xff] }
 0x14e   :  { %v263_v26 = vadd.f32 %v2810_v24, %v3827_v40  ;;  %v257_v27 = vpop.f32.mrb[17].mxu0  ;;  %v943_v24 = vld [vmem:[#allocation5 + $0x1d0] sm:$0xff] }
 0x14f   :  { %v258_v28 = vadd.f32 %v3827_v40, %v257_v27  ;;  %2885 = vmatprep.mubr.f32.mxu1 %v350_v23  ;;  %3495 = vmatpush3.bf16.msra.mxu1 %v3492_v15  ;;  %v3504_v23 = vpack.c.bf16 %v942_v22, %v941_v21  ;;  %v945_v27 = vld [vmem:[#allocation5 + $0x1e0] sm:$0xff] }
 0x150   :  { %2886 = vmatmul.mubr.f32.gmra.mrb[14].mxu1 %v351_v25  ;;  %v353_v31 = vmax.f32 %v263_v26, 0.0  ;;  %3497 = vmatprep.subr.bf16.mxu1 %v3496_v18  ;;  %v944_v25 = vld [vmem:[#allocation5 + $0x1d8] sm:$0xff] }
 0x151   :  { %v352_v29 = vmax.f32 %v258_v28, 0.0  ;;  %v2813_v30 = vpop.f32.mrb[18].mxu0  ;;  %v3508_v26 = vpack.c.bf16 %v944_v25, %v943_v24  ;;  %v946_v28 = vld [vmem:[#allocation5 + $0x1e8] sm:$0xff] }
 0x152   :  { %v273_v32 = vadd.f32 %v2813_v30, %v3827_v40  ;;  %v267_v33 = vpop.f32.mrb[19].mxu0  ;;  %v947_v30 = vld [vmem:[#allocation5 + $0x1f0] sm:$0xff] }
 0x153   :  { %v268_v34 = vadd.f32 %v3827_v40, %v267_v33  ;;  %2888 = vmatprep.mubr.f32.mxu1 %v352_v29  ;;  %3499 = vmatpush3.bf16.msra.mxu1 %v3496_v18  ;;  %v3512_v29 = vpack.c.bf16 %v946_v28, %v945_v27  ;;  %v3861_v33 = vld [vmem:[#allocation7 + $0x1] ss:$0 sm:$0xff] }
 0x154   :  { %2889 = vmatmul.mubr.f32.gmra.mrb[16].mxu1 %v353_v31  ;;  %v355_v37 = vmax.f32 %v273_v32, 0.0  ;;  %v948_v31 = vld [vmem:[#allocation5 + $0x1f8] sm:$0xff] }
 0x155   :  { %v354_v35 = vmax.f32 %v268_v34, 0.0  ;;  %v2816_v36 = vpop.f32.mrb[20].mxu0  ;;  %v3516_v32 = vpack.c.bf16 %v948_v31, %v947_v30 }
 0x156   :  { %v283_v38 = vadd.f32 %v2816_v36, %v3827_v40  ;;  %v277_v39 = vpop.f32.mrb[21].mxu0 }
 0x157   :  { %v278_v41 = vadd.f32 %v3827_v40, %v277_v39  ;;  %2891 = vmatprep.mubr.f32.mxu1 %v354_v35 }
 0x158   :  { %2892 = vmatmul.mubr.f32.gmra.mrb[18].mxu1 %v355_v37  ;;  %v357_v44 = vmax.f32 %v283_v38, 0.0 }
 0x159   :  { %v356_v42 = vmax.f32 %v278_v41, 0.0  ;;  %v2819_v43 = vpop.f32.mrb[22].mxu0 }
 0x15a   :  { %v293_v45 = vadd.f32 %v2819_v43, %v3827_v40  ;;  %v287_v46 = vpop.f32.mrb[23].mxu0 }
 0x15b   :  { %v288_v47 = vadd.f32 %v3827_v40, %v287_v46  ;;  %2894 = vmatprep.mubr.f32.mxu1 %v356_v42 }
 0x15c   :  { %2895 = vmatmul.mubr.f32.gmra.mrb[20].mxu1 %v357_v44  ;;  %v359_v50 = vmax.f32 %v293_v45, 0.0 }
 0x15d   :  { %v358_v48 = vmax.f32 %v288_v47, 0.0  ;;  %v2822_v49 = vpop.f32.mrb[24].mxu0 }
 0x15e   :  { %v303_v51 = vadd.f32 %v2822_v49, %v3827_v40  ;;  %v297_v52 = vpop.f32.mrb[25].mxu0 }
 0x15f   :  { %v298_v53 = vadd.f32 %v3827_v40, %v297_v52  ;;  %2897 = vmatprep.mubr.f32.mxu1 %v358_v48 }
 0x160   :  { %2898 = vmatmul.mubr.f32.gmra.mrb[22].mxu1 %v359_v50  ;;  %v361_v56 = vmax.f32 %v303_v51, 0.0 }
 0x161   :  { %v360_v54 = vmax.f32 %v298_v53, 0.0  ;;  %v2825_v55 = vpop.f32.mrb[26].mxu0 }
 0x162   :  { %v313_v57 = vadd.f32 %v2825_v55, %v3827_v40  ;;  %v307_v58 = vpop.f32.mrb[27].mxu0 }
 0x163   :  { %v308_v59 = vadd.f32 %v3827_v40, %v307_v58  ;;  %2900 = vmatprep.mubr.f32.mxu1 %v360_v54 }
 0x164   :  { %2901 = vmatmul.mubr.f32.gmra.mrb[24].mxu1 %v361_v56  ;;  %v363_v62 = vmax.f32 %v313_v57, 0.0 }
 0x165   :  { %v362_v60 = vmax.f32 %v308_v59, 0.0  ;;  %v2828_v61 = vpop.f32.mrb[28].mxu0 }
 0x166   :  { %v323_v63 = vadd.f32 %v2828_v61, %v3827_v40  ;;  %v317_v0 = vpop.f32.mrb[29].mxu0 }
 0x167   :  { %v318_v1 = vadd.f32 %v3827_v40, %v317_v0  ;;  %2903 = vmatprep.mubr.f32.mxu1 %v362_v60 }
 0x168   :  { %2904 = vmatmul.mubr.f32.gmra.mrb[26].mxu1 %v363_v62  ;;  %v365_v4 = vmax.f32 %v323_v63, 0.0 }
 0x169   :  { %v364_v2 = vmax.f32 %v318_v1, 0.0  ;;  %v2831_v3 = vpop.f32.mrb[30].mxu0 }
 0x16a   :  { %v333_v5 = vadd.f32 %v2831_v3, %v3827_v40  ;;  %v327_v6 = vpop.f32.mrb[31].mxu0 }
 0x16b   :  { %v328_v7 = vadd.f32 %v3827_v40, %v327_v6  ;;  %2906 = vmatprep.mubr.f32.mxu1 %v364_v2  ;;  %v940_v40 = vld [vmem:[#allocation5 + $0x1b8] sm:$0xff] }
 0x16c   :  { %2907 = vmatmul.mubr.f32.gmra.mrb[28].mxu1 %v365_v4  ;;  %v367_v9 = vmax.f32 %v333_v5, 0.0  ;;  %v3500_v20 = vpack.c.bf16 %v940_v40, %v939_v19 }
 0x16d   :  { %v366_v8 = vmax.f32 %v328_v7, 0.0 }
 0x16e   :  { %3501 = vmatprep.subr.bf16.mxu1 %v3500_v20 }
 0x16f   :  { %2909 = vmatprep.mubr.f32.mxu1 %v366_v8  ;;  %3503 = vmatpush3.bf16.msra.mxu1 %v3500_v20 }
 0x170   :  { %2910 = vmatmul.mubr.f32.gmra.mrb[30].mxu1 %v367_v9  ;;  %3505 = vmatprep.subr.bf16.mxu1 %v3504_v23 }
 0x173   :  { %3507 = vmatpush3.bf16.msra.mxu1 %v3504_v23 }
 0x174   :  { %3509 = vmatprep.subr.bf16.mxu1 %v3508_v26 }
 0x177   :  { %3511 = vmatpush3.bf16.msra.mxu1 %v3508_v26 }
 0x178   :  { %3513 = vmatprep.subr.bf16.mxu1 %v3512_v29 }
 0x17b   :  { %3515 = vmatpush3.bf16.msra.mxu1 %v3512_v29 }
 0x17c   :  { %3517 = vmatprep.subr.bf16.mxu1 %v3516_v32 }
 0x17f   :  { %3519 = vmatpush3.bf16.msra.mxu1 %v3516_v32 }
 0x207   :  { %v2866_v34 = vpop.f32.mrb[0].mxu1 }
 0x208   :  { %v465_v35 = vadd.f32 %v2866_v34, %v3861_v33  ;;  %v459_v36 = vpop.f32.mrb[1].mxu1 }
 0x209   :  { %v460_v37 = vadd.f32 %v3861_v33, %v459_v36 }
 0x20a   :  { %v619_v41 = vmax.f32 %v465_v35, 0.0 }
 0x20b   :  { %v618_v38 = vmax.f32 %v460_v37, 0.0  ;;  %v2869_v39 = vpop.f32.mrb[2].mxu1 }
 0x20c   :  { %v475_v42 = vadd.f32 %v2869_v39, %v3861_v33  ;;  %v469_v43 = vpop.f32.mrb[3].mxu1 }
 0x20d   :  { %v470_v44 = vadd.f32 %v3861_v33, %v469_v43  ;;  %2944 = vmatprep.mubr.f32.mxu0 %v618_v38 }
 0x20e   :  { %2945 = vmatmul.mubr.f32.vlgmr.msra.gmra.mrb[32].mxu0 %v619_v41  ;;  %v621_v47 = vmax.f32 %v475_v42, 0.0 }
 0x20f   :  { %v620_v45 = vmax.f32 %v470_v44, 0.0  ;;  %v2872_v46 = vpop.f32.mrb[4].mxu1 }
 0x210   :  { %v485_v48 = vadd.f32 %v2872_v46, %v3861_v33  ;;  %v479_v49 = vpop.f32.mrb[5].mxu1 }
 0x211   :  { %v480_v50 = vadd.f32 %v3861_v33, %v479_v49  ;;  %2947 = vmatprep.mubr.f32.mxu0 %v620_v45 }
 0x212   :  { %2948 = vmatmul.mubr.f32.gmra.mrb[34].mxu0 %v621_v47  ;;  %v623_v53 = vmax.f32 %v485_v48, 0.0 }
 0x213   :  { %v622_v51 = vmax.f32 %v480_v50, 0.0  ;;  %v2875_v52 = vpop.f32.mrb[6].mxu1 }
 0x214   :  { %v495_v54 = vadd.f32 %v2875_v52, %v3861_v33  ;;  %v489_v55 = vpop.f32.mrb[7].mxu1 }
 0x215   :  { %v490_v56 = vadd.f32 %v3861_v33, %v489_v55  ;;  %2950 = vmatprep.mubr.f32.mxu0 %v622_v51 }
 0x216   :  { %2951 = vmatmul.mubr.f32.gmra.mrb[36].mxu0 %v623_v53  ;;  %v625_v59 = vmax.f32 %v495_v54, 0.0 }
 0x217   :  { %v624_v57 = vmax.f32 %v490_v56, 0.0  ;;  %v2878_v58 = vpop.f32.mrb[8].mxu1 }
 0x218   :  { %v505_v60 = vadd.f32 %v2878_v58, %v3861_v33  ;;  %v499_v61 = vpop.f32.mrb[9].mxu1 }
 0x219   :  { %v500_v62 = vadd.f32 %v3861_v33, %v499_v61  ;;  %2953 = vmatprep.mubr.f32.mxu0 %v624_v57 }
 0x21a   :  { %2954 = vmatmul.mubr.f32.gmra.mrb[38].mxu0 %v625_v59  ;;  %v627_v1 = vmax.f32 %v505_v60, 0.0 }
 0x21b   :  { %v626_v63 = vmax.f32 %v500_v62, 0.0  ;;  %v2881_v0 = vpop.f32.mrb[10].mxu1 }
 0x21c   :  { %v515_v2 = vadd.f32 %v2881_v0, %v3861_v33  ;;  %v509_v3 = vpop.f32.mrb[11].mxu1 }
 0x21d   :  { %v510_v4 = vadd.f32 %v3861_v33, %v509_v3  ;;  %2956 = vmatprep.mubr.f32.mxu0 %v626_v63 }
 0x21e   :  { %2957 = vmatmul.mubr.f32.gmra.mrb[40].mxu0 %v627_v1  ;;  %v629_v7 = vmax.f32 %v515_v2, 0.0 }
 0x21f   :  { %v628_v5 = vmax.f32 %v510_v4, 0.0  ;;  %v2884_v6 = vpop.f32.mrb[12].mxu1  ;;  %v1215_v4 = vld [vmem:[#allocation5 + $0x200] sm:$0xff] }
 0x220   :  { %v525_v8 = vadd.f32 %v2884_v6, %v3861_v33  ;;  %v519_v9 = vpop.f32.mrb[13].mxu1  ;;  %v1217_v6 = vld [vmem:[#allocation5 + $0x210] sm:$0xff] }
 0x221   :  { %v520_v10 = vadd.f32 %v3861_v33, %v519_v9  ;;  %2959 = vmatprep.mubr.f32.mxu0 %v628_v5  ;;  %v1216_v5 = vld [vmem:[#allocation5 + $0x208] sm:$0xff] }
 0x222   :  { %2960 = vmatmul.mubr.f32.gmra.mrb[42].mxu0 %v629_v7  ;;  %v631_v13 = vmax.f32 %v525_v8, 0.0  ;;  %v3520_v7 = vpack.c.bf16 %v1216_v5, %v1215_v4  ;;  %v1218_v8 = vld [vmem:[#allocation5 + $0x218] sm:$0xff] }
 0x223   :  { %v630_v11 = vmax.f32 %v520_v10, 0.0  ;;  %v2887_v12 = vpop.f32.mrb[14].mxu1  ;;  %v3524_v9 = vpack.c.bf16 %v1218_v8, %v1217_v6  ;;  %v1219_v10 = vld [vmem:[#allocation5 + $0x220] sm:$0xff] }
 0x224   :  { %v535_v14 = vadd.f32 %v2887_v12, %v3861_v33  ;;  %v529_v15 = vpop.f32.mrb[15].mxu1  ;;  %3521 = vmatprep.subr.bf16.mxu0 %v3520_v7 }
 0x225   :  { %v530_v16 = vadd.f32 %v3861_v33, %v529_v15  ;;  %2962 = vmatprep.mubr.f32.mxu0 %v630_v11  ;;  %v1220_v11 = vld [vmem:[#allocation5 + $0x228] sm:$0xff]  ;;  %3523 = vmatpush3.bf16.msra.mxu0 %v3520_v7  ;;  %v1223_v15 = vld [vmem:[#allocation5 + $0x240] sm:$0xff] }
 0x226   :  { %2963 = vmatmul.mubr.f32.gmra.mrb[44].mxu0 %v631_v13  ;;  %v633_v19 = vmax.f32 %v535_v14, 0.0  ;;  %3525 = vmatprep.subr.bf16.mxu0 %v3524_v9  ;;  %v3528_v12 = vpack.c.bf16 %v1220_v11, %v1219_v10  ;;  %v1221_v13 = vld [vmem:[#allocation5 + $0x230] sm:$0xff] }
 0x227   :  { %v632_v17 = vmax.f32 %v530_v16, 0.0  ;;  %v2890_v18 = vpop.f32.mrb[16].mxu1  ;;  %v1224_v16 = vld [vmem:[#allocation5 + $0x248] sm:$0xff] }
 0x228   :  { %v545_v40 = vadd.f32 %v2890_v18, %v3861_v33  ;;  %v539_v20 = vpop.f32.mrb[17].mxu1  ;;  %v1225_v18 = vld [vmem:[#allocation5 + $0x250] sm:$0xff] }
 0x229   :  { %v540_v21 = vadd.f32 %v3861_v33, %v539_v20  ;;  %2965 = vmatprep.mubr.f32.mxu0 %v632_v17  ;;  %3527 = vmatpush3.bf16.msra.mxu0 %v3524_v9  ;;  %v3536_v17 = vpack.c.bf16 %v1224_v16, %v1223_v15  ;;  %v1227_v20 = vld [vmem:[#allocation5 + $0x260] sm:$0xff] }
 0x22a   :  { %2966 = vmatmul.mubr.f32.gmra.mrb[46].mxu0 %v633_v19  ;;  %v635_v24 = vmax.f32 %v545_v40, 0.0  ;;  %3529 = vmatprep.subr.bf16.mxu0 %v3528_v12  ;;  %v1226_v19 = vld [vmem:[#allocation5 + $0x258] sm:$0xff] }
 0x22b   :  { %v634_v22 = vmax.f32 %v540_v21, 0.0  ;;  %v2893_v23 = vpop.f32.mrb[18].mxu1  ;;  %v3540_v40 = vpack.c.bf16 %v1226_v19, %v1225_v18  ;;  %v1228_v21 = vld [vmem:[#allocation5 + $0x268] sm:$0xff] }
 0x22c   :  { %v555_v25 = vadd.f32 %v2893_v23, %v3861_v33  ;;  %v549_v26 = vpop.f32.mrb[19].mxu1  ;;  %v1229_v23 = vld [vmem:[#allocation5 + $0x270] sm:$0xff] }
 0x22d   :  { %v550_v27 = vadd.f32 %v3861_v33, %v549_v26  ;;  %2968 = vmatprep.mubr.f32.mxu0 %v634_v22  ;;  %3531 = vmatpush3.bf16.msra.mxu0 %v3528_v12  ;;  %v3544_v22 = vpack.c.bf16 %v1228_v21, %v1227_v20  ;;  %v3895_v26 = vld [vmem:[#allocation7 + $0x2] ss:$0 sm:$0xff] }
 0x22e   :  { %2969 = vmatmul.mubr.f32.gmra.mrb[48].mxu0 %v635_v24  ;;  %v637_v30 = vmax.f32 %v555_v25, 0.0  ;;  %v1230_v24 = vld [vmem:[#allocation5 + $0x278] sm:$0xff] }
 0x22f   :  { %v636_v28 = vmax.f32 %v550_v27, 0.0  ;;  %v2896_v29 = vpop.f32.mrb[20].mxu1  ;;  %v3548_v25 = vpack.c.bf16 %v1230_v24, %v1229_v23 }
 0x230   :  { %v565_v31 = vadd.f32 %v2896_v29, %v3861_v33  ;;  %v559_v32 = vpop.f32.mrb[21].mxu1 }
 0x231   :  { %v560_v34 = vadd.f32 %v3861_v33, %v559_v32  ;;  %2971 = vmatprep.mubr.f32.mxu0 %v636_v28 }
 0x232   :  { %2972 = vmatmul.mubr.f32.gmra.mrb[50].mxu0 %v637_v30  ;;  %v639_v37 = vmax.f32 %v565_v31, 0.0 }
 0x233   :  { %v638_v35 = vmax.f32 %v560_v34, 0.0  ;;  %v2899_v36 = vpop.f32.mrb[22].mxu1 }
 0x234   :  { %v575_v38 = vadd.f32 %v2899_v36, %v3861_v33  ;;  %v569_v39 = vpop.f32.mrb[23].mxu1 }
 0x235   :  { %v570_v41 = vadd.f32 %v3861_v33, %v569_v39  ;;  %2974 = vmatprep.mubr.f32.mxu0 %v638_v35 }
 0x236   :  { %2975 = vmatmul.mubr.f32.gmra.mrb[52].mxu0 %v639_v37  ;;  %v641_v44 = vmax.f32 %v575_v38, 0.0 }
 0x237   :  { %v640_v42 = vmax.f32 %v570_v41, 0.0  ;;  %v2902_v43 = vpop.f32.mrb[24].mxu1 }
 0x238   :  { %v585_v45 = vadd.f32 %v2902_v43, %v3861_v33  ;;  %v579_v46 = vpop.f32.mrb[25].mxu1 }
 0x239   :  { %v580_v47 = vadd.f32 %v3861_v33, %v579_v46  ;;  %2977 = vmatprep.mubr.f32.mxu0 %v640_v42 }
 0x23a   :  { %2978 = vmatmul.mubr.f32.gmra.mrb[54].mxu0 %v641_v44  ;;  %v643_v50 = vmax.f32 %v585_v45, 0.0 }
 0x23b   :  { %v642_v48 = vmax.f32 %v580_v47, 0.0  ;;  %v2905_v49 = vpop.f32.mrb[26].mxu1 }
 0x23c   :  { %v595_v51 = vadd.f32 %v2905_v49, %v3861_v33  ;;  %v589_v52 = vpop.f32.mrb[27].mxu1 }
 0x23d   :  { %v590_v53 = vadd.f32 %v3861_v33, %v589_v52  ;;  %2980 = vmatprep.mubr.f32.mxu0 %v642_v48 }
 0x23e   :  { %2981 = vmatmul.mubr.f32.gmra.mrb[56].mxu0 %v643_v50  ;;  %v645_v56 = vmax.f32 %v595_v51, 0.0 }
 0x23f   :  { %v644_v54 = vmax.f32 %v590_v53, 0.0  ;;  %v2908_v55 = vpop.f32.mrb[28].mxu1 }
 0x240   :  { %v605_v57 = vadd.f32 %v2908_v55, %v3861_v33  ;;  %v599_v58 = vpop.f32.mrb[29].mxu1 }
 0x241   :  { %v600_v59 = vadd.f32 %v3861_v33, %v599_v58  ;;  %2983 = vmatprep.mubr.f32.mxu0 %v644_v54 }
 0x242   :  { %2984 = vmatmul.mubr.f32.gmra.mrb[58].mxu0 %v645_v56  ;;  %v647_v62 = vmax.f32 %v605_v57, 0.0 }
 0x243   :  { %v646_v60 = vmax.f32 %v600_v59, 0.0  ;;  %v2911_v61 = vpop.f32.mrb[30].mxu1 }
 0x244   :  { %v615_v63 = vadd.f32 %v2911_v61, %v3861_v33  ;;  %v609_v0 = vpop.f32.mrb[31].mxu1 }
 0x245   :  { %v610_v1 = vadd.f32 %v3861_v33, %v609_v0  ;;  %2986 = vmatprep.mubr.f32.mxu0 %v646_v60  ;;  %v1222_v33 = vld [vmem:[#allocation5 + $0x238] sm:$0xff] }
 0x246   :  { %2987 = vmatmul.mubr.f32.gmra.mrb[60].mxu0 %v647_v62  ;;  %v649_v3 = vmax.f32 %v615_v63, 0.0  ;;  %v3532_v14 = vpack.c.bf16 %v1222_v33, %v1221_v13 }
 0x247   :  { %v648_v2 = vmax.f32 %v610_v1, 0.0 }
 0x248   :  { %3533 = vmatprep.subr.bf16.mxu0 %v3532_v14 }
 0x249   :  { %2989 = vmatprep.mubr.f32.mxu0 %v648_v2  ;;  %3535 = vmatpush3.bf16.msra.mxu0 %v3532_v14 }
 0x24a   :  { %2990 = vmatmul.mubr.f32.gmra.mrb[62].mxu0 %v649_v3  ;;  %3537 = vmatprep.subr.bf16.mxu0 %v3536_v17 }
 0x24d   :  { %3539 = vmatpush3.bf16.msra.mxu0 %v3536_v17 }
 0x24e   :  { %3541 = vmatprep.subr.bf16.mxu0 %v3540_v40 }
 0x251   :  { %3543 = vmatpush3.bf16.msra.mxu0 %v3540_v40 }
 0x252   :  { %3545 = vmatprep.subr.bf16.mxu0 %v3544_v22 }
 0x255   :  { %3547 = vmatpush3.bf16.msra.mxu0 %v3544_v22 }
 0x256   :  { %3549 = vmatprep.subr.bf16.mxu0 %v3548_v25 }
 0x259   :  { %3551 = vmatpush3.bf16.msra.mxu0 %v3548_v25 }
 0x2e1   :  { %v2946_v27 = vpop.f32.mrb[32].mxu0 }
 0x2e2   :  { %v747_v28 = vadd.f32 %v2946_v27, %v3895_v26  ;;  %v741_v29 = vpop.f32.mrb[33].mxu0 }
 0x2e3   :  { %v742_v30 = vadd.f32 %v3895_v26, %v741_v29 }
 0x2e4   :  { %v901_v34 = vmax.f32 %v747_v28, 0.0 }
 0x2e5   :  { %v900_v31 = vmax.f32 %v742_v30, 0.0  ;;  %v2949_v32 = vpop.f32.mrb[34].mxu0 }
 0x2e6   :  { %v757_v35 = vadd.f32 %v2949_v32, %v3895_v26  ;;  %v751_v36 = vpop.f32.mrb[35].mxu0 }
 0x2e7   :  { %v752_v37 = vadd.f32 %v3895_v26, %v751_v36  ;;  %3024 = vmatprep.mubr.f32.mxu1 %v900_v31 }
 0x2e8   :  { %3025 = vmatmul.mubr.f32.vlgmr.msra.gmra.mrb[32].mxu1 %v901_v34  ;;  %v903_v41 = vmax.f32 %v757_v35, 0.0 }
 0x2e9   :  { %v902_v38 = vmax.f32 %v752_v37, 0.0  ;;  %v2952_v39 = vpop.f32.mrb[36].mxu0 }
 0x2ea   :  { %v767_v42 = vadd.f32 %v2952_v39, %v3895_v26  ;;  %v761_v43 = vpop.f32.mrb[37].mxu0 }
 0x2eb   :  { %v762_v44 = vadd.f32 %v3895_v26, %v761_v43  ;;  %3027 = vmatprep.mubr.f32.mxu1 %v902_v38 }
 0x2ec   :  { %3028 = vmatmul.mubr.f32.gmra.mrb[34].mxu1 %v903_v41  ;;  %v905_v47 = vmax.f32 %v767_v42, 0.0 }
 0x2ed   :  { %v904_v45 = vmax.f32 %v762_v44, 0.0  ;;  %v2955_v46 = vpop.f32.mrb[38].mxu0 }
 0x2ee   :  { %v777_v48 = vadd.f32 %v2955_v46, %v3895_v26  ;;  %v771_v49 = vpop.f32.mrb[39].mxu0 }
 0x2ef   :  { %v772_v50 = vadd.f32 %v3895_v26, %v771_v49  ;;  %3030 = vmatprep.mubr.f32.mxu1 %v904_v45 }
 0x2f0   :  { %3031 = vmatmul.mubr.f32.gmra.mrb[36].mxu1 %v905_v47  ;;  %v907_v53 = vmax.f32 %v777_v48, 0.0 }
 0x2f1   :  { %v906_v51 = vmax.f32 %v772_v50, 0.0  ;;  %v2958_v52 = vpop.f32.mrb[40].mxu0 }
 0x2f2   :  { %v787_v54 = vadd.f32 %v2958_v52, %v3895_v26  ;;  %v781_v55 = vpop.f32.mrb[41].mxu0 }
 0x2f3   :  { %v782_v56 = vadd.f32 %v3895_v26, %v781_v55  ;;  %3033 = vmatprep.mubr.f32.mxu1 %v906_v51 }
 0x2f4   :  { %3034 = vmatmul.mubr.f32.gmra.mrb[38].mxu1 %v907_v53  ;;  %v909_v59 = vmax.f32 %v787_v54, 0.0 }
 0x2f5   :  { %v908_v57 = vmax.f32 %v782_v56, 0.0  ;;  %v2961_v58 = vpop.f32.mrb[42].mxu0 }
 0x2f6   :  { %v797_v60 = vadd.f32 %v2961_v58, %v3895_v26  ;;  %v791_v61 = vpop.f32.mrb[43].mxu0 }
 0x2f7   :  { %v792_v62 = vadd.f32 %v3895_v26, %v791_v61  ;;  %3036 = vmatprep.mubr.f32.mxu1 %v908_v57 }
 0x2f8   :  { %3037 = vmatmul.mubr.f32.gmra.mrb[40].mxu1 %v909_v59  ;;  %v911_v1 = vmax.f32 %v797_v60, 0.0 }
 0x2f9   :  { %v910_v63 = vmax.f32 %v792_v62, 0.0  ;;  %v2964_v0 = vpop.f32.mrb[44].mxu0  ;;  %v1497_v62 = vld [vmem:[#allocation5 + $0x280] sm:$0xff] }
 0x2fa   :  { %v807_v2 = vadd.f32 %v2964_v0, %v3895_v26  ;;  %v801_v3 = vpop.f32.mrb[45].mxu0  ;;  %v1499_v0 = vld [vmem:[#allocation5 + $0x290] sm:$0xff] }
 0x2fb   :  { %v802_v4 = vadd.f32 %v3895_v26, %v801_v3  ;;  %3039 = vmatprep.mubr.f32.mxu1 %v910_v63  ;;  %v1498_v63 = vld [vmem:[#allocation5 + $0x288] sm:$0xff] }
 0x2fc   :  { %3040 = vmatmul.mubr.f32.gmra.mrb[42].mxu1 %v911_v1  ;;  %v913_v7 = vmax.f32 %v807_v2, 0.0  ;;  %v3552_v1 = vpack.c.bf16 %v1498_v63, %v1497_v62  ;;  %v1500_v2 = vld [vmem:[#allocation5 + $0x298] sm:$0xff] }
 0x2fd   :  { %v912_v5 = vmax.f32 %v802_v4, 0.0  ;;  %v2967_v6 = vpop.f32.mrb[46].mxu0  ;;  %v3556_v3 = vpack.c.bf16 %v1500_v2, %v1499_v0  ;;  %v1501_v4 = vld [vmem:[#allocation5 + $0x2a0] sm:$0xff] }
 0x2fe   :  { %v817_v8 = vadd.f32 %v2967_v6, %v3895_v26  ;;  %v811_v9 = vpop.f32.mrb[47].mxu0  ;;  %3553 = vmatprep.subr.bf16.mxu1 %v3552_v1 }
 0x2ff   :  { %v812_v10 = vadd.f32 %v3895_v26, %v811_v9  ;;  %3042 = vmatprep.mubr.f32.mxu1 %v912_v5  ;;  %v1502_v5 = vld [vmem:[#allocation5 + $0x2a8] sm:$0xff]  ;;  %3555 = vmatpush3.bf16.msra.mxu1 %v3552_v1  ;;  %v1505_v9 = vld [vmem:[#allocation5 + $0x2c0] sm:$0xff] }
 0x300   :  { %3043 = vmatmul.mubr.f32.gmra.mrb[44].mxu1 %v913_v7  ;;  %v915_v13 = vmax.f32 %v817_v8, 0.0  ;;  %3557 = vmatprep.subr.bf16.mxu1 %v3556_v3  ;;  %v3560_v6 = vpack.c.bf16 %v1502_v5, %v1501_v4  ;;  %v1503_v7 = vld [vmem:[#allocation5 + $0x2b0] sm:$0xff] }
 0x301   :  { %v914_v11 = vmax.f32 %v812_v10, 0.0  ;;  %v2970_v12 = vpop.f32.mrb[48].mxu0  ;;  %v1506_v10 = vld [vmem:[#allocation5 + $0x2c8] sm:$0xff] }
 0x302   :  { %v827_v33 = vadd.f32 %v2970_v12, %v3895_v26  ;;  %v821_v14 = vpop.f32.mrb[49].mxu0  ;;  %v1507_v12 = vld [vmem:[#allocation5 + $0x2d0] sm:$0xff] }
 0x303   :  { %v822_v15 = vadd.f32 %v3895_v26, %v821_v14  ;;  %3045 = vmatprep.mubr.f32.mxu1 %v914_v11  ;;  %3559 = vmatpush3.bf16.msra.mxu1 %v3556_v3  ;;  %v3568_v11 = vpack.c.bf16 %v1506_v10, %v1505_v9  ;;  %v1509_v14 = vld [vmem:[#allocation5 + $0x2e0] sm:$0xff] }
 0x304   :  { %3046 = vmatmul.mubr.f32.gmra.mrb[46].mxu1 %v915_v13  ;;  %v917_v18 = vmax.f32 %v827_v33, 0.0  ;;  %3561 = vmatprep.subr.bf16.mxu1 %v3560_v6  ;;  %v1508_v13 = vld [vmem:[#allocation5 + $0x2d8] sm:$0xff] }
 0x305   :  { %v916_v16 = vmax.f32 %v822_v15, 0.0  ;;  %v2973_v17 = vpop.f32.mrb[50].mxu0  ;;  %v3572_v33 = vpack.c.bf16 %v1508_v13, %v1507_v12  ;;  %v1510_v15 = vld [vmem:[#allocation5 + $0x2e8] sm:$0xff] }
 0x306   :  { %v837_v19 = vadd.f32 %v2973_v17, %v3895_v26  ;;  %v831_v40 = vpop.f32.mrb[51].mxu0  ;;  %v1511_v17 = vld [vmem:[#allocation5 + $0x2f0] sm:$0xff] }
 0x307   :  { %v832_v20 = vadd.f32 %v3895_v26, %v831_v40  ;;  %3048 = vmatprep.mubr.f32.mxu1 %v916_v16  ;;  %3563 = vmatpush3.bf16.msra.mxu1 %v3560_v6  ;;  %v3576_v16 = vpack.c.bf16 %v1510_v15, %v1509_v14  ;;  %v3929_v40 = vld [vmem:[#allocation7 + $0x3] ss:$0 sm:$0xff] }
 0x308   :  { %3049 = vmatmul.mubr.f32.gmra.mrb[48].mxu1 %v917_v18  ;;  %v919_v23 = vmax.f32 %v837_v19, 0.0  ;;  %v1512_v18 = vld [vmem:[#allocation5 + $0x2f8] sm:$0xff] }
 0x309   :  { %v918_v21 = vmax.f32 %v832_v20, 0.0  ;;  %v2976_v22 = vpop.f32.mrb[52].mxu0  ;;  %v3580_v19 = vpack.c.bf16 %v1512_v18, %v1511_v17 }
 0x30a   :  { %v847_v24 = vadd.f32 %v2976_v22, %v3895_v26  ;;  %v841_v25 = vpop.f32.mrb[53].mxu0 }
 0x30b   :  { %v842_v27 = vadd.f32 %v3895_v26, %v841_v25  ;;  %3051 = vmatprep.mubr.f32.mxu1 %v918_v21 }
 0x30c   :  { %3052 = vmatmul.mubr.f32.gmra.mrb[50].mxu1 %v919_v23  ;;  %v921_v30 = vmax.f32 %v847_v24, 0.0 }
 0x30d   :  { %v920_v28 = vmax.f32 %v842_v27, 0.0  ;;  %v2979_v29 = vpop.f32.mrb[54].mxu0 }
 0x30e   :  { %v857_v31 = vadd.f32 %v2979_v29, %v3895_v26  ;;  %v851_v32 = vpop.f32.mrb[55].mxu0 }
 0x30f   :  { %v852_v34 = vadd.f32 %v3895_v26, %v851_v32  ;;  %3054 = vmatprep.mubr.f32.mxu1 %v920_v28 }
 0x310   :  { %3055 = vmatmul.mubr.f32.gmra.mrb[52].mxu1 %v921_v30  ;;  %v923_v37 = vmax.f32 %v857_v31, 0.0 }
 0x311   :  { %v922_v35 = vmax.f32 %v852_v34, 0.0  ;;  %v2982_v36 = vpop.f32.mrb[56].mxu0 }
 0x312   :  { %v867_v38 = vadd.f32 %v2982_v36, %v3895_v26  ;;  %v861_v39 = vpop.f32.mrb[57].mxu0 }
 0x313   :  { %v862_v41 = vadd.f32 %v3895_v26, %v861_v39  ;;  %3057 = vmatprep.mubr.f32.mxu1 %v922_v35 }
 0x314   :  { %3058 = vmatmul.mubr.f32.gmra.mrb[54].mxu1 %v923_v37  ;;  %v925_v44 = vmax.f32 %v867_v38, 0.0 }
 0x315   :  { %v924_v42 = vmax.f32 %v862_v41, 0.0  ;;  %v2985_v43 = vpop.f32.mrb[58].mxu0 }
 0x316   :  { %v877_v45 = vadd.f32 %v2985_v43, %v3895_v26  ;;  %v871_v46 = vpop.f32.mrb[59].mxu0 }
 0x317   :  { %v872_v47 = vadd.f32 %v3895_v26, %v871_v46  ;;  %3060 = vmatprep.mubr.f32.mxu1 %v924_v42 }
 0x318   :  { %3061 = vmatmul.mubr.f32.gmra.mrb[56].mxu1 %v925_v44  ;;  %v927_v50 = vmax.f32 %v877_v45, 0.0 }
 0x319   :  { %v926_v48 = vmax.f32 %v872_v47, 0.0  ;;  %v2988_v49 = vpop.f32.mrb[60].mxu0 }
 0x31a   :  { %v887_v51 = vadd.f32 %v2988_v49, %v3895_v26  ;;  %v881_v52 = vpop.f32.mrb[61].mxu0 }
 0x31b   :  { %v882_v53 = vadd.f32 %v3895_v26, %v881_v52  ;;  %3063 = vmatprep.mubr.f32.mxu1 %v926_v48 }
 0x31c   :  { %3064 = vmatmul.mubr.f32.gmra.mrb[58].mxu1 %v927_v50  ;;  %v929_v56 = vmax.f32 %v887_v51, 0.0 }
 0x31d   :  { %v928_v54 = vmax.f32 %v882_v53, 0.0  ;;  %v2991_v55 = vpop.f32.mrb[62].mxu0 }
 0x31e   :  { %v897_v57 = vadd.f32 %v2991_v55, %v3895_v26  ;;  %v891_v58 = vpop.f32.mrb[63].mxu0 }
 0x31f   :  { %v892_v59 = vadd.f32 %v3895_v26, %v891_v58  ;;  %3066 = vmatprep.mubr.f32.mxu1 %v928_v54  ;;  %v1504_v26 = vld [vmem:[#allocation5 + $0x2b8] sm:$0xff] }
 0x320   :  { %3067 = vmatmul.mubr.f32.gmra.mrb[60].mxu1 %v929_v56  ;;  %v931_v61 = vmax.f32 %v897_v57, 0.0  ;;  %v3564_v8 = vpack.c.bf16 %v1504_v26, %v1503_v7 }
 0x321   :  { %v930_v60 = vmax.f32 %v892_v59, 0.0 }
 0x322   :  { %3565 = vmatprep.subr.bf16.mxu1 %v3564_v8 }
 0x323   :  { %3069 = vmatprep.mubr.f32.mxu1 %v930_v60  ;;  %3567 = vmatpush3.bf16.msra.mxu1 %v3564_v8 }
 0x324   :  { %3070 = vmatmul.mubr.f32.gmra.mrb[62].mxu1 %v931_v61  ;;  %3569 = vmatprep.subr.bf16.mxu1 %v3568_v11 }
 0x327   :  { %3571 = vmatpush3.bf16.msra.mxu1 %v3568_v11 }
 0x328   :  { %3573 = vmatprep.subr.bf16.mxu1 %v3572_v33 }
 0x32b   :  { %3575 = vmatpush3.bf16.msra.mxu1 %v3572_v33 }
 0x32c   :  { %3577 = vmatprep.subr.bf16.mxu1 %v3576_v16 }
 0x32f   :  { %3579 = vmatpush3.bf16.msra.mxu1 %v3576_v16 }
 0x330   :  { %3581 = vmatprep.subr.bf16.mxu1 %v3580_v19 }
 0x333   :  { %3583 = vmatpush3.bf16.msra.mxu1 %v3580_v19 }
 0x3bb   :  { %v3026_v20 = vpop.f32.mrb[32].mxu1 }
 0x3bc   :  { %v1029_v21 = vadd.f32 %v3026_v20, %v3929_v40  ;;  %v1023_v22 = vpop.f32.mrb[33].mxu1 }
 0x3bd   :  { %v1024_v23 = vadd.f32 %v3929_v40, %v1023_v22 }
 0x3be   :  { %v1183_v27 = vmax.f32 %v1029_v21, 0.0 }
 0x3bf   :  { %v1182_v24 = vmax.f32 %v1024_v23, 0.0  ;;  %v3029_v25 = vpop.f32.mrb[34].mxu1 }
 0x3c0   :  { %v1039_v28 = vadd.f32 %v3029_v25, %v3929_v40  ;;  %v1033_v29 = vpop.f32.mrb[35].mxu1 }
 0x3c1   :  { %v1034_v30 = vadd.f32 %v3929_v40, %v1033_v29  ;;  %3104 = vmatprep.mubr.f32.mxu0 %v1182_v24 }
 0x3c2   :  { %3105 = vmatmul.mubr.f32.vlgmr.msra.gmra.mrb[64].mxu0 %v1183_v27  ;;  %v1185_v34 = vmax.f32 %v1039_v28, 0.0 }
 0x3c3   :  { %v1184_v31 = vmax.f32 %v1034_v30, 0.0  ;;  %v3032_v32 = vpop.f32.mrb[36].mxu1 }
 0x3c4   :  { %v1049_v35 = vadd.f32 %v3032_v32, %v3929_v40  ;;  %v1043_v36 = vpop.f32.mrb[37].mxu1 }
 0x3c5   :  { %v1044_v37 = vadd.f32 %v3929_v40, %v1043_v36  ;;  %3107 = vmatprep.mubr.f32.mxu0 %v1184_v31 }
 0x3c6   :  { %3108 = vmatmul.mubr.f32.gmra.mrb[66].mxu0 %v1185_v34  ;;  %v1187_v41 = vmax.f32 %v1049_v35, 0.0 }
 0x3c7   :  { %v1186_v38 = vmax.f32 %v1044_v37, 0.0  ;;  %v3035_v39 = vpop.f32.mrb[38].mxu1 }
 0x3c8   :  { %v1059_v42 = vadd.f32 %v3035_v39, %v3929_v40  ;;  %v1053_v43 = vpop.f32.mrb[39].mxu1 }
 0x3c9   :  { %v1054_v44 = vadd.f32 %v3929_v40, %v1053_v43  ;;  %3110 = vmatprep.mubr.f32.mxu0 %v1186_v38 }
 0x3ca   :  { %3111 = vmatmul.mubr.f32.gmra.mrb[68].mxu0 %v1187_v41  ;;  %v1189_v47 = vmax.f32 %v1059_v42, 0.0 }
 0x3cb   :  { %v1188_v45 = vmax.f32 %v1054_v44, 0.0  ;;  %v3038_v46 = vpop.f32.mrb[40].mxu1 }
 0x3cc   :  { %v1069_v48 = vadd.f32 %v3038_v46, %v3929_v40  ;;  %v1063_v49 = vpop.f32.mrb[41].mxu1 }
 0x3cd   :  { %v1064_v50 = vadd.f32 %v3929_v40, %v1063_v49  ;;  %3113 = vmatprep.mubr.f32.mxu0 %v1188_v45 }
 0x3ce   :  { %3114 = vmatmul.mubr.f32.gmra.mrb[70].mxu0 %v1189_v47  ;;  %v1191_v53 = vmax.f32 %v1069_v48, 0.0 }
 0x3cf   :  { %v1190_v51 = vmax.f32 %v1064_v50, 0.0  ;;  %v3041_v52 = vpop.f32.mrb[42].mxu1 }
 0x3d0   :  { %v1079_v54 = vadd.f32 %v3041_v52, %v3929_v40  ;;  %v1073_v55 = vpop.f32.mrb[43].mxu1 }
 0x3d1   :  { %v1074_v56 = vadd.f32 %v3929_v40, %v1073_v55  ;;  %3116 = vmatprep.mubr.f32.mxu0 %v1190_v51 }
 0x3d2   :  { %3117 = vmatmul.mubr.f32.gmra.mrb[72].mxu0 %v1191_v53  ;;  %v1193_v59 = vmax.f32 %v1079_v54, 0.0 }
 0x3d3   :  { %v1192_v57 = vmax.f32 %v1074_v56, 0.0  ;;  %v3044_v58 = vpop.f32.mrb[44].mxu1  ;;  %v1779_v56 = vld [vmem:[#allocation5 + $0x300] sm:$0xff] }
 0x3d4   :  { %v1089_v60 = vadd.f32 %v3044_v58, %v3929_v40  ;;  %v1083_v61 = vpop.f32.mrb[45].mxu1  ;;  %v1781_v58 = vld [vmem:[#allocation5 + $0x310] sm:$0xff] }
 0x3d5   :  { %v1084_v62 = vadd.f32 %v3929_v40, %v1083_v61  ;;  %3119 = vmatprep.mubr.f32.mxu0 %v1192_v57  ;;  %v1780_v57 = vld [vmem:[#allocation5 + $0x308] sm:$0xff] }
 0x3d6   :  { %3120 = vmatmul.mubr.f32.gmra.mrb[74].mxu0 %v1193_v59  ;;  %v1195_v1 = vmax.f32 %v1089_v60, 0.0  ;;  %v3584_v59 = vpack.c.bf16 %v1780_v57, %v1779_v56  ;;  %v1782_v60 = vld [vmem:[#allocation5 + $0x318] sm:$0xff] }
 0x3d7   :  { %v1194_v63 = vmax.f32 %v1084_v62, 0.0  ;;  %v3047_v0 = vpop.f32.mrb[46].mxu1  ;;  %v3588_v61 = vpack.c.bf16 %v1782_v60, %v1781_v58  ;;  %v1783_v62 = vld [vmem:[#allocation5 + $0x320] sm:$0xff] }
 0x3d8   :  { %v1099_v2 = vadd.f32 %v3047_v0, %v3929_v40  ;;  %v1093_v3 = vpop.f32.mrb[47].mxu1  ;;  %3585 = vmatprep.subr.bf16.mxu0 %v3584_v59 }
 0x3d9   :  { %v1094_v4 = vadd.f32 %v3929_v40, %v1093_v3  ;;  %3122 = vmatprep.mubr.f32.mxu0 %v1194_v63  ;;  %v1784_v63 = vld [vmem:[#allocation5 + $0x328] sm:$0xff]  ;;  %3587 = vmatpush3.bf16.msra.mxu0 %v3584_v59  ;;  %v1787_v3 = vld [vmem:[#allocation5 + $0x340] sm:$0xff] }
 0x3da   :  { %3123 = vmatmul.mubr.f32.gmra.mrb[76].mxu0 %v1195_v1  ;;  %v1197_v7 = vmax.f32 %v1099_v2, 0.0  ;;  %3589 = vmatprep.subr.bf16.mxu0 %v3588_v61  ;;  %v3592_v0 = vpack.c.bf16 %v1784_v63, %v1783_v62  ;;  %v1785_v1 = vld [vmem:[#allocation5 + $0x330] sm:$0xff] }
 0x3db   :  { %v1196_v5 = vmax.f32 %v1094_v4, 0.0  ;;  %v3050_v6 = vpop.f32.mrb[48].mxu1  ;;  %v1788_v4 = vld [vmem:[#allocation5 + $0x348] sm:$0xff] }
 0x3dc   :  { %v1109_v26 = vadd.f32 %v3050_v6, %v3929_v40  ;;  %v1103_v8 = vpop.f32.mrb[49].mxu1  ;;  %v1789_v6 = vld [vmem:[#allocation5 + $0x350] sm:$0xff] }
 0x3dd   :  { %v1104_v9 = vadd.f32 %v3929_v40, %v1103_v8  ;;  %3125 = vmatprep.mubr.f32.mxu0 %v1196_v5  ;;  %3591 = vmatpush3.bf16.msra.mxu0 %v3588_v61  ;;  %v3600_v5 = vpack.c.bf16 %v1788_v4, %v1787_v3  ;;  %v1791_v8 = vld [vmem:[#allocation5 + $0x360] sm:$0xff] }
 0x3de   :  { %3126 = vmatmul.mubr.f32.gmra.mrb[78].mxu0 %v1197_v7  ;;  %v1199_v12 = vmax.f32 %v1109_v26, 0.0  ;;  %3593 = vmatprep.subr.bf16.mxu0 %v3592_v0  ;;  %v1790_v7 = vld [vmem:[#allocation5 + $0x358] sm:$0xff] }
 0x3df   :  { %v1198_v10 = vmax.f32 %v1104_v9, 0.0  ;;  %v3053_v11 = vpop.f32.mrb[50].mxu1  ;;  %v3604_v26 = vpack.c.bf16 %v1790_v7, %v1789_v6  ;;  %v1792_v9 = vld [vmem:[#allocation5 + $0x368] sm:$0xff] }
 0x3e0   :  { %v1119_v13 = vadd.f32 %v3053_v11, %v3929_v40  ;;  %v1113_v33 = vpop.f32.mrb[51].mxu1  ;;  %v1793_v11 = vld [vmem:[#allocation5 + $0x370] sm:$0xff] }
 0x3e1   :  { %v1114_v14 = vadd.f32 %v3929_v40, %v1113_v33  ;;  %3128 = vmatprep.mubr.f32.mxu0 %v1198_v10  ;;  %3595 = vmatpush3.bf16.msra.mxu0 %v3592_v0  ;;  %v3608_v10 = vpack.c.bf16 %v1792_v9, %v1791_v8  ;;  %v3963_v33 = vld [vmem:[#allocation7 + $0x4] ss:$0 sm:$0xff] }
 0x3e2   :  { %3129 = vmatmul.mubr.f32.gmra.mrb[80].mxu0 %v1199_v12  ;;  %v1201_v17 = vmax.f32 %v1119_v13, 0.0  ;;  %v1794_v12 = vld [vmem:[#allocation5 + $0x378] sm:$0xff] }
 0x3e3   :  { %v1200_v15 = vmax.f32 %v1114_v14, 0.0  ;;  %v3056_v16 = vpop.f32.mrb[52].mxu1  ;;  %v3612_v13 = vpack.c.bf16 %v1794_v12, %v1793_v11 }
 0x3e4   :  { %v1129_v18 = vadd.f32 %v3056_v16, %v3929_v40  ;;  %v1123_v19 = vpop.f32.mrb[53].mxu1 }
 0x3e5   :  { %v1124_v20 = vadd.f32 %v3929_v40, %v1123_v19  ;;  %3131 = vmatprep.mubr.f32.mxu0 %v1200_v15 }
 0x3e6   :  { %3132 = vmatmul.mubr.f32.gmra.mrb[82].mxu0 %v1201_v17  ;;  %v1203_v23 = vmax.f32 %v1129_v18, 0.0 }
 0x3e7   :  { %v1202_v21 = vmax.f32 %v1124_v20, 0.0  ;;  %v3059_v22 = vpop.f32.mrb[54].mxu1 }
 0x3e8   :  { %v1139_v24 = vadd.f32 %v3059_v22, %v3929_v40  ;;  %v1133_v25 = vpop.f32.mrb[55].mxu1 }
 0x3e9   :  { %v1134_v27 = vadd.f32 %v3929_v40, %v1133_v25  ;;  %3134 = vmatprep.mubr.f32.mxu0 %v1202_v21 }
 0x3ea   :  { %3135 = vmatmul.mubr.f32.gmra.mrb[84].mxu0 %v1203_v23  ;;  %v1205_v30 = vmax.f32 %v1139_v24, 0.0 }
 0x3eb   :  { %v1204_v28 = vmax.f32 %v1134_v27, 0.0  ;;  %v3062_v29 = vpop.f32.mrb[56].mxu1 }
 0x3ec   :  { %v1149_v31 = vadd.f32 %v3062_v29, %v3929_v40  ;;  %v1143_v32 = vpop.f32.mrb[57].mxu1 }
 0x3ed   :  { %v1144_v34 = vadd.f32 %v3929_v40, %v1143_v32  ;;  %3137 = vmatprep.mubr.f32.mxu0 %v1204_v28 }
 0x3ee   :  { %3138 = vmatmul.mubr.f32.gmra.mrb[86].mxu0 %v1205_v30  ;;  %v1207_v37 = vmax.f32 %v1149_v31, 0.0 }
 0x3ef   :  { %v1206_v35 = vmax.f32 %v1144_v34, 0.0  ;;  %v3065_v36 = vpop.f32.mrb[58].mxu1 }
 0x3f0   :  { %v1159_v38 = vadd.f32 %v3065_v36, %v3929_v40  ;;  %v1153_v39 = vpop.f32.mrb[59].mxu1 }
 0x3f1   :  { %v1154_v41 = vadd.f32 %v3929_v40, %v1153_v39  ;;  %3140 = vmatprep.mubr.f32.mxu0 %v1206_v35 }
 0x3f2   :  { %3141 = vmatmul.mubr.f32.gmra.mrb[88].mxu0 %v1207_v37  ;;  %v1209_v44 = vmax.f32 %v1159_v38, 0.0 }
 0x3f3   :  { %v1208_v42 = vmax.f32 %v1154_v41, 0.0  ;;  %v3068_v43 = vpop.f32.mrb[60].mxu1 }
 0x3f4   :  { %v1169_v45 = vadd.f32 %v3068_v43, %v3929_v40  ;;  %v1163_v46 = vpop.f32.mrb[61].mxu1 }
 0x3f5   :  { %v1164_v47 = vadd.f32 %v3929_v40, %v1163_v46  ;;  %3143 = vmatprep.mubr.f32.mxu0 %v1208_v42 }
 0x3f6   :  { %3144 = vmatmul.mubr.f32.gmra.mrb[90].mxu0 %v1209_v44  ;;  %v1211_v50 = vmax.f32 %v1169_v45, 0.0 }
 0x3f7   :  { %v1210_v48 = vmax.f32 %v1164_v47, 0.0  ;;  %v3071_v49 = vpop.f32.mrb[62].mxu1 }
 0x3f8   :  { %v1179_v51 = vadd.f32 %v3071_v49, %v3929_v40  ;;  %v1173_v52 = vpop.f32.mrb[63].mxu1 }
 0x3f9   :  { %v1174_v53 = vadd.f32 %v3929_v40, %v1173_v52  ;;  %3146 = vmatprep.mubr.f32.mxu0 %v1210_v48  ;;  %v1786_v40 = vld [vmem:[#allocation5 + $0x338] sm:$0xff] }
 0x3fa   :  { %3147 = vmatmul.mubr.f32.gmra.mrb[92].mxu0 %v1211_v50  ;;  %v1213_v55 = vmax.f32 %v1179_v51, 0.0  ;;  %v3596_v2 = vpack.c.bf16 %v1786_v40, %v1785_v1 }
 0x3fb   :  { %v1212_v54 = vmax.f32 %v1174_v53, 0.0 }
 0x3fc   :  { %3597 = vmatprep.subr.bf16.mxu0 %v3596_v2 }
 0x3fd   :  { %3149 = vmatprep.mubr.f32.mxu0 %v1212_v54  ;;  %3599 = vmatpush3.bf16.msra.mxu0 %v3596_v2 }
 0x3fe   :  { %3150 = vmatmul.mubr.f32.gmra.mrb[94].mxu0 %v1213_v55  ;;  %3601 = vmatprep.subr.bf16.mxu0 %v3600_v5 }
 0x401   :  { %3603 = vmatpush3.bf16.msra.mxu0 %v3600_v5 }
 0x402   :  { %3605 = vmatprep.subr.bf16.mxu0 %v3604_v26 }
 0x405   :  { %3607 = vmatpush3.bf16.msra.mxu0 %v3604_v26 }
 0x406   :  { %3609 = vmatprep.subr.bf16.mxu0 %v3608_v10 }
 0x409   :  { %3611 = vmatpush3.bf16.msra.mxu0 %v3608_v10 }
 0x40a   :  { %3613 = vmatprep.subr.bf16.mxu0 %v3612_v13 }
 0x40d   :  { %3615 = vmatpush3.bf16.msra.mxu0 %v3612_v13 }
 0x495   :  { %v3106_v14 = vpop.f32.mrb[64].mxu0 }
 0x496   :  { %v1311_v15 = vadd.f32 %v3106_v14, %v3963_v33  ;;  %v1305_v16 = vpop.f32.mrb[65].mxu0 }
 0x497   :  { %v1306_v17 = vadd.f32 %v3963_v33, %v1305_v16 }
 0x498   :  { %v1465_v20 = vmax.f32 %v1311_v15, 0.0 }
 0x499   :  { %v1464_v18 = vmax.f32 %v1306_v17, 0.0  ;;  %v3109_v19 = vpop.f32.mrb[66].mxu0 }
 0x49a   :  { %v1321_v21 = vadd.f32 %v3109_v19, %v3963_v33  ;;  %v1315_v22 = vpop.f32.mrb[67].mxu0 }
 0x49b   :  { %v1316_v23 = vadd.f32 %v3963_v33, %v1315_v22  ;;  %3184 = vmatprep.mubr.f32.mxu1 %v1464_v18 }
 0x49c   :  { %3185 = vmatmul.mubr.f32.vlgmr.msra.gmra.mrb[64].mxu1 %v1465_v20  ;;  %v1467_v27 = vmax.f32 %v1321_v21, 0.0 }
 0x49d   :  { %v1466_v24 = vmax.f32 %v1316_v23, 0.0  ;;  %v3112_v25 = vpop.f32.mrb[68].mxu0 }
 0x49e   :  { %v1331_v28 = vadd.f32 %v3112_v25, %v3963_v33  ;;  %v1325_v29 = vpop.f32.mrb[69].mxu0 }
 0x49f   :  { %v1326_v30 = vadd.f32 %v3963_v33, %v1325_v29  ;;  %3187 = vmatprep.mubr.f32.mxu1 %v1466_v24 }
 0x4a0   :  { %3188 = vmatmul.mubr.f32.gmra.mrb[66].mxu1 %v1467_v27  ;;  %v1469_v34 = vmax.f32 %v1331_v28, 0.0 }
 0x4a1   :  { %v1468_v31 = vmax.f32 %v1326_v30, 0.0  ;;  %v3115_v32 = vpop.f32.mrb[70].mxu0 }
 0x4a2   :  { %v1341_v35 = vadd.f32 %v3115_v32, %v3963_v33  ;;  %v1335_v36 = vpop.f32.mrb[71].mxu0 }
 0x4a3   :  { %v1336_v37 = vadd.f32 %v3963_v33, %v1335_v36  ;;  %3190 = vmatprep.mubr.f32.mxu1 %v1468_v31 }
 0x4a4   :  { %3191 = vmatmul.mubr.f32.gmra.mrb[68].mxu1 %v1469_v34  ;;  %v1471_v41 = vmax.f32 %v1341_v35, 0.0 }
 0x4a5   :  { %v1470_v38 = vmax.f32 %v1336_v37, 0.0  ;;  %v3118_v39 = vpop.f32.mrb[72].mxu0 }
 0x4a6   :  { %v1351_v42 = vadd.f32 %v3118_v39, %v3963_v33  ;;  %v1345_v43 = vpop.f32.mrb[73].mxu0 }
 0x4a7   :  { %v1346_v44 = vadd.f32 %v3963_v33, %v1345_v43  ;;  %3193 = vmatprep.mubr.f32.mxu1 %v1470_v38 }
 0x4a8   :  { %3194 = vmatmul.mubr.f32.gmra.mrb[70].mxu1 %v1471_v41  ;;  %v1473_v47 = vmax.f32 %v1351_v42, 0.0 }
 0x4a9   :  { %v1472_v45 = vmax.f32 %v1346_v44, 0.0  ;;  %v3121_v46 = vpop.f32.mrb[74].mxu0 }
 0x4aa   :  { %v1361_v48 = vadd.f32 %v3121_v46, %v3963_v33  ;;  %v1355_v49 = vpop.f32.mrb[75].mxu0 }
 0x4ab   :  { %v1356_v50 = vadd.f32 %v3963_v33, %v1355_v49  ;;  %3196 = vmatprep.mubr.f32.mxu1 %v1472_v45 }
 0x4ac   :  { %3197 = vmatmul.mubr.f32.gmra.mrb[72].mxu1 %v1473_v47  ;;  %v1475_v53 = vmax.f32 %v1361_v48, 0.0 }
 0x4ad   :  { %v1474_v51 = vmax.f32 %v1356_v50, 0.0  ;;  %v3124_v52 = vpop.f32.mrb[76].mxu0  ;;  %v2061_v50 = vld [vmem:[#allocation5 + $0x380] sm:$0xff] }
 0x4ae   :  { %v1371_v54 = vadd.f32 %v3124_v52, %v3963_v33  ;;  %v1365_v55 = vpop.f32.mrb[77].mxu0  ;;  %v2063_v52 = vld [vmem:[#allocation5 + $0x390] sm:$0xff] }
 0x4af   :  { %v1366_v56 = vadd.f32 %v3963_v33, %v1365_v55  ;;  %3199 = vmatprep.mubr.f32.mxu1 %v1474_v51  ;;  %v2062_v51 = vld [vmem:[#allocation5 + $0x388] sm:$0xff] }
 0x4b0   :  { %3200 = vmatmul.mubr.f32.gmra.mrb[74].mxu1 %v1475_v53  ;;  %v1477_v59 = vmax.f32 %v1371_v54, 0.0  ;;  %v3616_v53 = vpack.c.bf16 %v2062_v51, %v2061_v50  ;;  %v2064_v54 = vld [vmem:[#allocation5 + $0x398] sm:$0xff] }
 0x4b1   :  { %v1476_v57 = vmax.f32 %v1366_v56, 0.0  ;;  %v3127_v58 = vpop.f32.mrb[78].mxu0  ;;  %v3620_v55 = vpack.c.bf16 %v2064_v54, %v2063_v52  ;;  %v2065_v56 = vld [vmem:[#allocation5 + $0x3a0] sm:$0xff] }
 0x4b2   :  { %v1381_v60 = vadd.f32 %v3127_v58, %v3963_v33  ;;  %v1375_v61 = vpop.f32.mrb[79].mxu0  ;;  %3617 = vmatprep.subr.bf16.mxu1 %v3616_v53 }
 0x4b3   :  { %v1376_v62 = vadd.f32 %v3963_v33, %v1375_v61  ;;  %3202 = vmatprep.mubr.f32.mxu1 %v1476_v57  ;;  %v2066_v57 = vld [vmem:[#allocation5 + $0x3a8] sm:$0xff]  ;;  %3619 = vmatpush3.bf16.msra.mxu1 %v3616_v53  ;;  %v2069_v61 = vld [vmem:[#allocation5 + $0x3c0] sm:$0xff] }
 0x4b4   :  { %3203 = vmatmul.mubr.f32.gmra.mrb[76].mxu1 %v1477_v59  ;;  %v1479_v1 = vmax.f32 %v1381_v60, 0.0  ;;  %3621 = vmatprep.subr.bf16.mxu1 %v3620_v55  ;;  %v3624_v58 = vpack.c.bf16 %v2066_v57, %v2065_v56  ;;  %v2067_v59 = vld [vmem:[#allocation5 + $0x3b0] sm:$0xff] }
 0x4b5   :  { %v1478_v63 = vmax.f32 %v1376_v62, 0.0  ;;  %v3130_v0 = vpop.f32.mrb[80].mxu0  ;;  %v2070_v62 = vld [vmem:[#allocation5 + $0x3c8] sm:$0xff] }
 0x4b6   :  { %v1391_v40 = vadd.f32 %v3130_v0, %v3963_v33  ;;  %v1385_v2 = vpop.f32.mrb[81].mxu0  ;;  %v2071_v0 = vld [vmem:[#allocation5 + $0x3d0] sm:$0xff] }
 0x4b7   :  { %v1386_v3 = vadd.f32 %v3963_v33, %v1385_v2  ;;  %3205 = vmatprep.mubr.f32.mxu1 %v1478_v63  ;;  %3623 = vmatpush3.bf16.msra.mxu1 %v3620_v55  ;;  %v3632_v63 = vpack.c.bf16 %v2070_v62, %v2069_v61  ;;  %v2073_v2 = vld [vmem:[#allocation5 + $0x3e0] sm:$0xff] }
 0x4b8   :  { %3206 = vmatmul.mubr.f32.gmra.mrb[78].mxu1 %v1479_v1  ;;  %v1481_v6 = vmax.f32 %v1391_v40, 0.0  ;;  %3625 = vmatprep.subr.bf16.mxu1 %v3624_v58  ;;  %v2072_v1 = vld [vmem:[#allocation5 + $0x3d8] sm:$0xff] }
 0x4b9   :  { %v1480_v4 = vmax.f32 %v1386_v3, 0.0  ;;  %v3133_v5 = vpop.f32.mrb[82].mxu0  ;;  %v3636_v40 = vpack.c.bf16 %v2072_v1, %v2071_v0  ;;  %v2074_v3 = vld [vmem:[#allocation5 + $0x3e8] sm:$0xff] }
 0x4ba   :  { %v1401_v7 = vadd.f32 %v3133_v5, %v3963_v33  ;;  %v1395_v26 = vpop.f32.mrb[83].mxu0  ;;  %v2075_v5 = vld [vmem:[#allocation5 + $0x3f0] sm:$0xff] }
 0x4bb   :  { %v1396_v8 = vadd.f32 %v3963_v33, %v1395_v26  ;;  %3208 = vmatprep.mubr.f32.mxu1 %v1480_v4  ;;  %3627 = vmatpush3.bf16.msra.mxu1 %v3624_v58  ;;  %v3640_v4 = vpack.c.bf16 %v2074_v3, %v2073_v2  ;;  %v3997_v26 = vld [vmem:[#allocation7 + $0x5] ss:$0 sm:$0xff] }
 0x4bc   :  { %3209 = vmatmul.mubr.f32.gmra.mrb[80].mxu1 %v1481_v6  ;;  %v1483_v11 = vmax.f32 %v1401_v7, 0.0  ;;  %v2076_v6 = vld [vmem:[#allocation5 + $0x3f8] sm:$0xff] }
 0x4bd   :  { %v1482_v9 = vmax.f32 %v1396_v8, 0.0  ;;  %v3136_v10 = vpop.f32.mrb[84].mxu0  ;;  %v3644_v7 = vpack.c.bf16 %v2076_v6, %v2075_v5 }
 0x4be   :  { %v1411_v12 = vadd.f32 %v3136_v10, %v3963_v33  ;;  %v1405_v13 = vpop.f32.mrb[85].mxu0 }
 0x4bf   :  { %v1406_v14 = vadd.f32 %v3963_v33, %v1405_v13  ;;  %3211 = vmatprep.mubr.f32.mxu1 %v1482_v9 }
 0x4c0   :  { %3212 = vmatmul.mubr.f32.gmra.mrb[82].mxu1 %v1483_v11  ;;  %v1485_v17 = vmax.f32 %v1411_v12, 0.0 }
 0x4c1   :  { %v1484_v15 = vmax.f32 %v1406_v14, 0.0  ;;  %v3139_v16 = vpop.f32.mrb[86].mxu0 }
 0x4c2   :  { %v1421_v18 = vadd.f32 %v3139_v16, %v3963_v33  ;;  %v1415_v19 = vpop.f32.mrb[87].mxu0 }
 0x4c3   :  { %v1416_v20 = vadd.f32 %v3963_v33, %v1415_v19  ;;  %3214 = vmatprep.mubr.f32.mxu1 %v1484_v15 }
 0x4c4   :  { %3215 = vmatmul.mubr.f32.gmra.mrb[84].mxu1 %v1485_v17  ;;  %v1487_v23 = vmax.f32 %v1421_v18, 0.0 }
 0x4c5   :  { %v1486_v21 = vmax.f32 %v1416_v20, 0.0  ;;  %v3142_v22 = vpop.f32.mrb[88].mxu0 }
 0x4c6   :  { %v1431_v24 = vadd.f32 %v3142_v22, %v3963_v33  ;;  %v1425_v25 = vpop.f32.mrb[89].mxu0 }
 0x4c7   :  { %v1426_v27 = vadd.f32 %v3963_v33, %v1425_v25  ;;  %3217 = vmatprep.mubr.f32.mxu1 %v1486_v21 }
 0x4c8   :  { %3218 = vmatmul.mubr.f32.gmra.mrb[86].mxu1 %v1487_v23  ;;  %v1489_v30 = vmax.f32 %v1431_v24, 0.0 }
 0x4c9   :  { %v1488_v28 = vmax.f32 %v1426_v27, 0.0  ;;  %v3145_v29 = vpop.f32.mrb[90].mxu0 }
 0x4ca   :  { %v1441_v31 = vadd.f32 %v3145_v29, %v3963_v33  ;;  %v1435_v32 = vpop.f32.mrb[91].mxu0 }
 0x4cb   :  { %v1436_v34 = vadd.f32 %v3963_v33, %v1435_v32  ;;  %3220 = vmatprep.mubr.f32.mxu1 %v1488_v28 }
 0x4cc   :  { %3221 = vmatmul.mubr.f32.gmra.mrb[88].mxu1 %v1489_v30  ;;  %v1491_v37 = vmax.f32 %v1441_v31, 0.0 }
 0x4cd   :  { %v1490_v35 = vmax.f32 %v1436_v34, 0.0  ;;  %v3148_v36 = vpop.f32.mrb[92].mxu0 }
 0x4ce   :  { %v1451_v38 = vadd.f32 %v3148_v36, %v3963_v33  ;;  %v1445_v39 = vpop.f32.mrb[93].mxu0 }
 0x4cf   :  { %v1446_v41 = vadd.f32 %v3963_v33, %v1445_v39  ;;  %3223 = vmatprep.mubr.f32.mxu1 %v1490_v35 }
 0x4d0   :  { %3224 = vmatmul.mubr.f32.gmra.mrb[90].mxu1 %v1491_v37  ;;  %v1493_v44 = vmax.f32 %v1451_v38, 0.0 }
 0x4d1   :  { %v1492_v42 = vmax.f32 %v1446_v41, 0.0  ;;  %v3151_v43 = vpop.f32.mrb[94].mxu0 }
 0x4d2   :  { %v1461_v45 = vadd.f32 %v3151_v43, %v3963_v33  ;;  %v1455_v46 = vpop.f32.mrb[95].mxu0 }
 0x4d3   :  { %v1456_v47 = vadd.f32 %v3963_v33, %v1455_v46  ;;  %3226 = vmatprep.mubr.f32.mxu1 %v1492_v42  ;;  %v2068_v33 = vld [vmem:[#allocation5 + $0x3b8] sm:$0xff] }
 0x4d4   :  { %3227 = vmatmul.mubr.f32.gmra.mrb[92].mxu1 %v1493_v44  ;;  %v1495_v49 = vmax.f32 %v1461_v45, 0.0  ;;  %v3628_v60 = vpack.c.bf16 %v2068_v33, %v2067_v59 }
 0x4d5   :  { %v1494_v48 = vmax.f32 %v1456_v47, 0.0 }
 0x4d6   :  { %3629 = vmatprep.subr.bf16.mxu1 %v3628_v60 }
 0x4d7   :  { %3229 = vmatprep.mubr.f32.mxu1 %v1494_v48  ;;  %3631 = vmatpush3.bf16.msra.mxu1 %v3628_v60 }
 0x4d8   :  { %3230 = vmatmul.mubr.f32.gmra.mrb[94].mxu1 %v1495_v49  ;;  %3633 = vmatprep.subr.bf16.mxu1 %v3632_v63 }
 0x4db   :  { %3635 = vmatpush3.bf16.msra.mxu1 %v3632_v63 }
 0x4dc   :  { %3637 = vmatprep.subr.bf16.mxu1 %v3636_v40 }
 0x4df   :  { %3639 = vmatpush3.bf16.msra.mxu1 %v3636_v40 }
 0x4e0   :  { %3641 = vmatprep.subr.bf16.mxu1 %v3640_v4 }
 0x4e3   :  { %3643 = vmatpush3.bf16.msra.mxu1 %v3640_v4 }
 0x4e4   :  { %3645 = vmatprep.subr.bf16.mxu1 %v3644_v7 }
 0x4e7   :  { %3647 = vmatpush3.bf16.msra.mxu1 %v3644_v7 }
 0x56f   :  { %v3186_v8 = vpop.f32.mrb[64].mxu1 }
 0x570   :  { %v1593_v9 = vadd.f32 %v3186_v8, %v3997_v26  ;;  %v1587_v10 = vpop.f32.mrb[65].mxu1 }
 0x571   :  { %v1588_v11 = vadd.f32 %v3997_v26, %v1587_v10 }
 0x572   :  { %v1747_v14 = vmax.f32 %v1593_v9, 0.0 }
 0x573   :  { %v1746_v12 = vmax.f32 %v1588_v11, 0.0  ;;  %v3189_v13 = vpop.f32.mrb[66].mxu1 }
 0x574   :  { %v1603_v15 = vadd.f32 %v3189_v13, %v3997_v26  ;;  %v1597_v16 = vpop.f32.mrb[67].mxu1 }
 0x575   :  { %v1598_v17 = vadd.f32 %v3997_v26, %v1597_v16  ;;  %3264 = vmatprep.mubr.f32.mxu0 %v1746_v12 }
 0x576   :  { %3265 = vmatmul.mubr.f32.vlgmr.msra.gmra.mrb[96].mxu0 %v1747_v14  ;;  %v1749_v20 = vmax.f32 %v1603_v15, 0.0 }
 0x577   :  { %v1748_v18 = vmax.f32 %v1598_v17, 0.0  ;;  %v3192_v19 = vpop.f32.mrb[68].mxu1 }
 0x578   :  { %v1613_v21 = vadd.f32 %v3192_v19, %v3997_v26  ;;  %v1607_v22 = vpop.f32.mrb[69].mxu1 }
 0x579   :  { %v1608_v23 = vadd.f32 %v3997_v26, %v1607_v22  ;;  %3267 = vmatprep.mubr.f32.mxu0 %v1748_v18 }
 0x57a   :  { %3268 = vmatmul.mubr.f32.gmra.mrb[98].mxu0 %v1749_v20  ;;  %v1751_v27 = vmax.f32 %v1613_v21, 0.0 }
 0x57b   :  { %v1750_v24 = vmax.f32 %v1608_v23, 0.0  ;;  %v3195_v25 = vpop.f32.mrb[70].mxu1 }
 0x57c   :  { %v1623_v28 = vadd.f32 %v3195_v25, %v3997_v26  ;;  %v1617_v29 = vpop.f32.mrb[71].mxu1 }
 0x57d   :  { %v1618_v30 = vadd.f32 %v3997_v26, %v1617_v29  ;;  %3270 = vmatprep.mubr.f32.mxu0 %v1750_v24 }
 0x57e   :  { %3271 = vmatmul.mubr.f32.gmra.mrb[100].mxu0 %v1751_v27  ;;  %v1753_v34 = vmax.f32 %v1623_v28, 0.0 }
 0x57f   :  { %v1752_v31 = vmax.f32 %v1618_v30, 0.0  ;;  %v3198_v32 = vpop.f32.mrb[72].mxu1 }
 0x580   :  { %v1633_v35 = vadd.f32 %v3198_v32, %v3997_v26  ;;  %v1627_v36 = vpop.f32.mrb[73].mxu1 }
 0x581   :  { %v1628_v37 = vadd.f32 %v3997_v26, %v1627_v36  ;;  %3273 = vmatprep.mubr.f32.mxu0 %v1752_v31 }
 0x582   :  { %3274 = vmatmul.mubr.f32.gmra.mrb[102].mxu0 %v1753_v34  ;;  %v1755_v41 = vmax.f32 %v1633_v35, 0.0 }
 0x583   :  { %v1754_v38 = vmax.f32 %v1628_v37, 0.0  ;;  %v3201_v39 = vpop.f32.mrb[74].mxu1 }
 0x584   :  { %v1643_v42 = vadd.f32 %v3201_v39, %v3997_v26  ;;  %v1637_v43 = vpop.f32.mrb[75].mxu1 }
 0x585   :  { %v1638_v44 = vadd.f32 %v3997_v26, %v1637_v43  ;;  %3276 = vmatprep.mubr.f32.mxu0 %v1754_v38 }
 0x586   :  { %3277 = vmatmul.mubr.f32.gmra.mrb[104].mxu0 %v1755_v41  ;;  %v1757_v47 = vmax.f32 %v1643_v42, 0.0 }
 0x587   :  { %v1756_v45 = vmax.f32 %v1638_v44, 0.0  ;;  %v3204_v46 = vpop.f32.mrb[76].mxu1  ;;  %v4031_v44 = vld [vmem:[#allocation7 + $0x6] ss:$0 sm:$0xff] }
 0x588   :  { %v1653_v48 = vadd.f32 %v3204_v46, %v3997_v26  ;;  %v1647_v49 = vpop.f32.mrb[77].mxu1 }
 0x589   :  { %v1648_v50 = vadd.f32 %v3997_v26, %v1647_v49  ;;  %3279 = vmatprep.mubr.f32.mxu0 %v1756_v45 }
 0x58a   :  { %3280 = vmatmul.mubr.f32.gmra.mrb[106].mxu0 %v1757_v47  ;;  %v1759_v53 = vmax.f32 %v1653_v48, 0.0 }
 0x58b   :  { %v1758_v51 = vmax.f32 %v1648_v50, 0.0  ;;  %v3207_v52 = vpop.f32.mrb[78].mxu1 }
 0x58c   :  { %v1663_v54 = vadd.f32 %v3207_v52, %v3997_v26  ;;  %v1657_v55 = vpop.f32.mrb[79].mxu1 }
 0x58d   :  { %v1658_v56 = vadd.f32 %v3997_v26, %v1657_v55  ;;  %3282 = vmatprep.mubr.f32.mxu0 %v1758_v51 }
 0x58e   :  { %3283 = vmatmul.mubr.f32.gmra.mrb[108].mxu0 %v1759_v53  ;;  %v1761_v59 = vmax.f32 %v1663_v54, 0.0 }
 0x58f   :  { %v1760_v57 = vmax.f32 %v1658_v56, 0.0  ;;  %v3210_v58 = vpop.f32.mrb[80].mxu1 }
 0x590   :  { %v1673_v33 = vadd.f32 %v3210_v58, %v3997_v26  ;;  %v1667_v60 = vpop.f32.mrb[81].mxu1 }
 0x591   :  { %v1668_v61 = vadd.f32 %v3997_v26, %v1667_v60  ;;  %3285 = vmatprep.mubr.f32.mxu0 %v1760_v57 }
 0x592   :  { %3286 = vmatmul.mubr.f32.gmra.mrb[110].mxu0 %v1761_v59  ;;  %v1763_v0 = vmax.f32 %v1673_v33, 0.0 }
 0x593   :  { %v1762_v62 = vmax.f32 %v1668_v61, 0.0  ;;  %v3213_v63 = vpop.f32.mrb[82].mxu1 }
 0x594   :  { %v1683_v1 = vadd.f32 %v3213_v63, %v3997_v26  ;;  %v1677_v40 = vpop.f32.mrb[83].mxu1 }
 0x595   :  { %v1678_v2 = vadd.f32 %v3997_v26, %v1677_v40  ;;  %3288 = vmatprep.mubr.f32.mxu0 %v1762_v62 }
 0x596   :  { %3289 = vmatmul.mubr.f32.gmra.mrb[112].mxu0 %v1763_v0  ;;  %v1765_v5 = vmax.f32 %v1683_v1, 0.0 }
 0x597   :  { %v1764_v3 = vmax.f32 %v1678_v2, 0.0  ;;  %v3216_v4 = vpop.f32.mrb[84].mxu1 }
 0x598   :  { %v1693_v6 = vadd.f32 %v3216_v4, %v3997_v26  ;;  %v1687_v7 = vpop.f32.mrb[85].mxu1 }
 0x599   :  { %v1688_v8 = vadd.f32 %v3997_v26, %v1687_v7  ;;  %3291 = vmatprep.mubr.f32.mxu0 %v1764_v3 }
 0x59a   :  { %3292 = vmatmul.mubr.f32.gmra.mrb[114].mxu0 %v1765_v5  ;;  %v1767_v11 = vmax.f32 %v1693_v6, 0.0 }
 0x59b   :  { %v1766_v9 = vmax.f32 %v1688_v8, 0.0  ;;  %v3219_v10 = vpop.f32.mrb[86].mxu1 }
 0x59c   :  { %v1703_v12 = vadd.f32 %v3219_v10, %v3997_v26  ;;  %v1697_v13 = vpop.f32.mrb[87].mxu1 }
 0x59d   :  { %v1698_v14 = vadd.f32 %v3997_v26, %v1697_v13  ;;  %3294 = vmatprep.mubr.f32.mxu0 %v1766_v9 }
 0x59e   :  { %3295 = vmatmul.mubr.f32.gmra.mrb[116].mxu0 %v1767_v11  ;;  %v1769_v17 = vmax.f32 %v1703_v12, 0.0 }
 0x59f   :  { %v1768_v15 = vmax.f32 %v1698_v14, 0.0  ;;  %v3222_v16 = vpop.f32.mrb[88].mxu1 }
 0x5a0   :  { %v1713_v18 = vadd.f32 %v3222_v16, %v3997_v26  ;;  %v1707_v19 = vpop.f32.mrb[89].mxu1 }
 0x5a1   :  { %v1708_v20 = vadd.f32 %v3997_v26, %v1707_v19  ;;  %3297 = vmatprep.mubr.f32.mxu0 %v1768_v15 }
 0x5a2   :  { %3298 = vmatmul.mubr.f32.gmra.mrb[118].mxu0 %v1769_v17  ;;  %v1771_v23 = vmax.f32 %v1713_v18, 0.0 }
 0x5a3   :  { %v1770_v21 = vmax.f32 %v1708_v20, 0.0  ;;  %v3225_v22 = vpop.f32.mrb[90].mxu1 }
 0x5a4   :  { %v1723_v24 = vadd.f32 %v3225_v22, %v3997_v26  ;;  %v1717_v25 = vpop.f32.mrb[91].mxu1 }
 0x5a5   :  { %v1718_v27 = vadd.f32 %v3997_v26, %v1717_v25  ;;  %3300 = vmatprep.mubr.f32.mxu0 %v1770_v21 }
 0x5a6   :  { %3301 = vmatmul.mubr.f32.gmra.mrb[120].mxu0 %v1771_v23  ;;  %v1773_v30 = vmax.f32 %v1723_v24, 0.0 }
 0x5a7   :  { %v1772_v28 = vmax.f32 %v1718_v27, 0.0  ;;  %v3228_v29 = vpop.f32.mrb[92].mxu1 }
 0x5a8   :  { %v1733_v31 = vadd.f32 %v3228_v29, %v3997_v26  ;;  %v1727_v32 = vpop.f32.mrb[93].mxu1 }
 0x5a9   :  { %v1728_v34 = vadd.f32 %v3997_v26, %v1727_v32  ;;  %3303 = vmatprep.mubr.f32.mxu0 %v1772_v28 }
 0x5aa   :  { %3304 = vmatmul.mubr.f32.gmra.mrb[122].mxu0 %v1773_v30  ;;  %v1775_v37 = vmax.f32 %v1733_v31, 0.0 }
 0x5ab   :  { %v1774_v35 = vmax.f32 %v1728_v34, 0.0  ;;  %v3231_v36 = vpop.f32.mrb[94].mxu1 }
 0x5ac   :  { %v1743_v38 = vadd.f32 %v3231_v36, %v3997_v26  ;;  %v1737_v39 = vpop.f32.mrb[95].mxu1 }
 0x5ad   :  { %v1738_v41 = vadd.f32 %v3997_v26, %v1737_v39  ;;  %3306 = vmatprep.mubr.f32.mxu0 %v1774_v35 }
 0x5ae   :  { %3307 = vmatmul.mubr.f32.gmra.mrb[124].mxu0 %v1775_v37  ;;  %v1777_v43 = vmax.f32 %v1743_v38, 0.0 }
 0x5af   :  { %v1776_v42 = vmax.f32 %v1738_v41, 0.0 }
 0x5b1   :  { %3309 = vmatprep.mubr.f32.mxu0 %v1776_v42 }
 0x5b2   :  { %3310 = vmatmul.mubr.f32.gmra.mrb[126].mxu0 %v1777_v43 }
 0x649   :  { %v3266_v45 = vpop.f32.mrb[96].mxu0 }
 0x64a   :  { %v1875_v46 = vadd.f32 %v3266_v45, %v4031_v44  ;;  %v1869_v47 = vpop.f32.mrb[97].mxu0 }
 0x64b   :  { %v1870_v48 = vadd.f32 %v4031_v44, %v1869_v47 }
 0x64c   :  { %v2029_v51 = vmax.f32 %v1875_v46, 0.0 }
 0x64d   :  { %v2028_v49 = vmax.f32 %v1870_v48, 0.0  ;;  %v3269_v50 = vpop.f32.mrb[98].mxu0 }
 0x64e   :  { %v1885_v52 = vadd.f32 %v3269_v50, %v4031_v44  ;;  %v1879_v26 = vpop.f32.mrb[99].mxu0 }
 0x64f   :  { %v1880_v53 = vadd.f32 %v4031_v44, %v1879_v26  ;;  %3344 = vmatprep.mubr.f32.mxu1 %v2028_v49 }
 0x650   :  { %3345 = vmatmul.mubr.f32.vlgmr.msra.gmra.mrb[96].mxu1 %v2029_v51  ;;  %v2031_v56 = vmax.f32 %v1885_v52, 0.0 }
 0x651   :  { %v2030_v54 = vmax.f32 %v1880_v53, 0.0  ;;  %v3272_v55 = vpop.f32.mrb[100].mxu0 }
 0x652   :  { %v1895_v57 = vadd.f32 %v3272_v55, %v4031_v44  ;;  %v1889_v58 = vpop.f32.mrb[101].mxu0 }
 0x653   :  { %v1890_v59 = vadd.f32 %v4031_v44, %v1889_v58  ;;  %3347 = vmatprep.mubr.f32.mxu1 %v2030_v54 }
 0x654   :  { %3348 = vmatmul.mubr.f32.gmra.mrb[98].mxu1 %v2031_v56  ;;  %v2033_v61 = vmax.f32 %v1895_v57, 0.0 }
 0x655   :  { %v2032_v33 = vmax.f32 %v1890_v59, 0.0  ;;  %v3275_v60 = vpop.f32.mrb[102].mxu0 }
 0x656   :  { %v1905_v62 = vadd.f32 %v3275_v60, %v4031_v44  ;;  %v1899_v63 = vpop.f32.mrb[103].mxu0 }
 0x657   :  { %v1900_v0 = vadd.f32 %v4031_v44, %v1899_v63  ;;  %3350 = vmatprep.mubr.f32.mxu1 %v2032_v33 }
 0x658   :  { %3351 = vmatmul.mubr.f32.gmra.mrb[100].mxu1 %v2033_v61  ;;  %v2035_v2 = vmax.f32 %v1905_v62, 0.0 }
 0x659   :  { %v2034_v1 = vmax.f32 %v1900_v0, 0.0  ;;  %v3278_v40 = vpop.f32.mrb[104].mxu0 }
 0x65a   :  { %v1915_v3 = vadd.f32 %v3278_v40, %v4031_v44  ;;  %v1909_v4 = vpop.f32.mrb[105].mxu0 }
 0x65b   :  { %v1910_v5 = vadd.f32 %v4031_v44, %v1909_v4  ;;  %3353 = vmatprep.mubr.f32.mxu1 %v2034_v1 }
 0x65c   :  { %3354 = vmatmul.mubr.f32.gmra.mrb[102].mxu1 %v2035_v2  ;;  %v2037_v8 = vmax.f32 %v1915_v3, 0.0 }
 0x65d   :  { %v2036_v6 = vmax.f32 %v1910_v5, 0.0  ;;  %v3281_v7 = vpop.f32.mrb[106].mxu0 }
 0x65e   :  { %v1925_v9 = vadd.f32 %v3281_v7, %v4031_v44  ;;  %v1919_v10 = vpop.f32.mrb[107].mxu0 }
 0x65f   :  { %v1920_v11 = vadd.f32 %v4031_v44, %v1919_v10  ;;  %3356 = vmatprep.mubr.f32.mxu1 %v2036_v6 }
 0x660   :  { %3357 = vmatmul.mubr.f32.gmra.mrb[104].mxu1 %v2037_v8  ;;  %v2039_v14 = vmax.f32 %v1925_v9, 0.0 }
 0x661   :  { %v2038_v12 = vmax.f32 %v1920_v11, 0.0  ;;  %v3284_v13 = vpop.f32.mrb[108].mxu0  ;;  %v4065_v11 = vld [vmem:[#allocation7 + $0x7] ss:$0 sm:$0xff] }
 0x662   :  { %v1935_v15 = vadd.f32 %v3284_v13, %v4031_v44  ;;  %v1929_v16 = vpop.f32.mrb[109].mxu0 }
 0x663   :  { %v1930_v17 = vadd.f32 %v4031_v44, %v1929_v16  ;;  %3359 = vmatprep.mubr.f32.mxu1 %v2038_v12 }
 0x664   :  { %3360 = vmatmul.mubr.f32.gmra.mrb[106].mxu1 %v2039_v14  ;;  %v2041_v20 = vmax.f32 %v1935_v15, 0.0 }
 0x665   :  { %v2040_v18 = vmax.f32 %v1930_v17, 0.0  ;;  %v3287_v19 = vpop.f32.mrb[110].mxu0 }
 0x666   :  { %v1945_v21 = vadd.f32 %v3287_v19, %v4031_v44  ;;  %v1939_v22 = vpop.f32.mrb[111].mxu0 }
 0x667   :  { %v1940_v23 = vadd.f32 %v4031_v44, %v1939_v22  ;;  %3362 = vmatprep.mubr.f32.mxu1 %v2040_v18 }
 0x668   :  { %3363 = vmatmul.mubr.f32.gmra.mrb[108].mxu1 %v2041_v20  ;;  %v2043_v27 = vmax.f32 %v1945_v21, 0.0 }
 0x669   :  { %v2042_v24 = vmax.f32 %v1940_v23, 0.0  ;;  %v3290_v25 = vpop.f32.mrb[112].mxu0 }
 0x66a   :  { %v1955_v28 = vadd.f32 %v3290_v25, %v4031_v44  ;;  %v1949_v29 = vpop.f32.mrb[113].mxu0 }
 0x66b   :  { %v1950_v30 = vadd.f32 %v4031_v44, %v1949_v29  ;;  %3365 = vmatprep.mubr.f32.mxu1 %v2042_v24 }
 0x66c   :  { %3366 = vmatmul.mubr.f32.gmra.mrb[110].mxu1 %v2043_v27  ;;  %v2045_v34 = vmax.f32 %v1955_v28, 0.0 }
 0x66d   :  { %v2044_v31 = vmax.f32 %v1950_v30, 0.0  ;;  %v3293_v32 = vpop.f32.mrb[114].mxu0 }
 0x66e   :  { %v1965_v35 = vadd.f32 %v3293_v32, %v4031_v44  ;;  %v1959_v36 = vpop.f32.mrb[115].mxu0 }
 0x66f   :  { %v1960_v37 = vadd.f32 %v4031_v44, %v1959_v36  ;;  %3368 = vmatprep.mubr.f32.mxu1 %v2044_v31 }
 0x670   :  { %3369 = vmatmul.mubr.f32.gmra.mrb[112].mxu1 %v2045_v34  ;;  %v2047_v41 = vmax.f32 %v1965_v35, 0.0 }
 0x671   :  { %v2046_v38 = vmax.f32 %v1960_v37, 0.0  ;;  %v3296_v39 = vpop.f32.mrb[116].mxu0 }
 0x672   :  { %v1975_v42 = vadd.f32 %v3296_v39, %v4031_v44  ;;  %v1969_v43 = vpop.f32.mrb[117].mxu0 }
 0x673   :  { %v1970_v45 = vadd.f32 %v4031_v44, %v1969_v43  ;;  %3371 = vmatprep.mubr.f32.mxu1 %v2046_v38 }
 0x674   :  { %3372 = vmatmul.mubr.f32.gmra.mrb[114].mxu1 %v2047_v41  ;;  %v2049_v48 = vmax.f32 %v1975_v42, 0.0 }
 0x675   :  { %v2048_v46 = vmax.f32 %v1970_v45, 0.0  ;;  %v3299_v47 = vpop.f32.mrb[118].mxu0 }
 0x676   :  { %v1985_v49 = vadd.f32 %v3299_v47, %v4031_v44  ;;  %v1979_v50 = vpop.f32.mrb[119].mxu0 }
 0x677   :  { %v1980_v51 = vadd.f32 %v4031_v44, %v1979_v50  ;;  %3374 = vmatprep.mubr.f32.mxu1 %v2048_v46 }
 0x678   :  { %3375 = vmatmul.mubr.f32.gmra.mrb[116].mxu1 %v2049_v48  ;;  %v2051_v53 = vmax.f32 %v1985_v49, 0.0 }
 0x679   :  { %v2050_v52 = vmax.f32 %v1980_v51, 0.0  ;;  %v3302_v26 = vpop.f32.mrb[120].mxu0 }
 0x67a   :  { %v1995_v54 = vadd.f32 %v3302_v26, %v4031_v44  ;;  %v1989_v55 = vpop.f32.mrb[121].mxu0 }
 0x67b   :  { %v1990_v56 = vadd.f32 %v4031_v44, %v1989_v55  ;;  %3377 = vmatprep.mubr.f32.mxu1 %v2050_v52 }
 0x67c   :  { %3378 = vmatmul.mubr.f32.gmra.mrb[118].mxu1 %v2051_v53  ;;  %v2053_v59 = vmax.f32 %v1995_v54, 0.0 }
 0x67d   :  { %v2052_v57 = vmax.f32 %v1990_v56, 0.0  ;;  %v3305_v58 = vpop.f32.mrb[122].mxu0 }
 0x67e   :  { %v2005_v33 = vadd.f32 %v3305_v58, %v4031_v44  ;;  %v1999_v60 = vpop.f32.mrb[123].mxu0 }
 0x67f   :  { %v2000_v61 = vadd.f32 %v4031_v44, %v1999_v60  ;;  %3380 = vmatprep.mubr.f32.mxu1 %v2052_v57 }
 0x680   :  { %3381 = vmatmul.mubr.f32.gmra.mrb[120].mxu1 %v2053_v59  ;;  %v2055_v0 = vmax.f32 %v2005_v33, 0.0 }
 0x681   :  { %v2054_v62 = vmax.f32 %v2000_v61, 0.0  ;;  %v3308_v63 = vpop.f32.mrb[124].mxu0 }
 0x682   :  { %v2015_v1 = vadd.f32 %v3308_v63, %v4031_v44  ;;  %v2009_v40 = vpop.f32.mrb[125].mxu0 }
 0x683   :  { %v2010_v2 = vadd.f32 %v4031_v44, %v2009_v40  ;;  %3383 = vmatprep.mubr.f32.mxu1 %v2054_v62 }
 0x684   :  { %3384 = vmatmul.mubr.f32.gmra.mrb[122].mxu1 %v2055_v0  ;;  %v2057_v5 = vmax.f32 %v2015_v1, 0.0 }
 0x685   :  { %v2056_v3 = vmax.f32 %v2010_v2, 0.0  ;;  %v3311_v4 = vpop.f32.mrb[126].mxu0 }
 0x686   :  { %v2025_v6 = vadd.f32 %v3311_v4, %v4031_v44  ;;  %v2019_v7 = vpop.f32.mrb[127].mxu0 }
 0x687   :  { %v2020_v8 = vadd.f32 %v4031_v44, %v2019_v7  ;;  %3386 = vmatprep.mubr.f32.mxu1 %v2056_v3 }
 0x688   :  { %3387 = vmatmul.mubr.f32.gmra.mrb[124].mxu1 %v2057_v5  ;;  %v2059_v10 = vmax.f32 %v2025_v6, 0.0 }
 0x689   :  { %v2058_v9 = vmax.f32 %v2020_v8, 0.0 }
 0x68b   :  { %3389 = vmatprep.mubr.f32.mxu1 %v2058_v9 }
 0x68c   :  { %3390 = vmatmul.mubr.f32.gmra.mrb[126].mxu1 %v2059_v10 }
 0x723   :  { %v3346_v12 = vpop.f32.mrb[96].mxu1 }
 0x724   :  { %v2157_v13 = vadd.f32 %v3346_v12, %v4065_v11  ;;  %v2151_v14 = vpop.f32.mrb[97].mxu1 }
 0x725   :  { %v2152_v15 = vadd.f32 %v4065_v11, %v2151_v14 }
 0x726   :  { %2311 = vst [vmem:[#allocation8 + $0x8] sm:$0xff] %v2157_v13 }
 0x727   :  { %2310 = vst [vmem:[#allocation8] sm:$0xff] %v2152_v15  ;;  %v3349_v16 = vpop.f32.mrb[98].mxu1 }
 0x728   :  { %v2167_v17 = vadd.f32 %v3349_v16, %v4065_v11  ;;  %v2161_v44 = vpop.f32.mrb[99].mxu1 }
 0x729   :  { %v2162_v18 = vadd.f32 %v4065_v11, %v2161_v44 }
 0x72a   :  { %2313 = vst [vmem:[#allocation8 + $0x18] sm:$0xff] %v2167_v17 }
 0x72b   :  { %2312 = vst [vmem:[#allocation8 + $0x10] sm:$0xff] %v2162_v18  ;;  %v3352_v19 = vpop.f32.mrb[100].mxu1 }
 0x72c   :  { %v2177_v20 = vadd.f32 %v3352_v19, %v4065_v11  ;;  %v2171_v21 = vpop.f32.mrb[101].mxu1 }
 0x72d   :  { %v2172_v22 = vadd.f32 %v4065_v11, %v2171_v21 }
 0x72e   :  { %2315 = vst [vmem:[#allocation8 + $0x28] sm:$0xff] %v2177_v20 }
 0x72f   :  { %2314 = vst [vmem:[#allocation8 + $0x20] sm:$0xff] %v2172_v22  ;;  %v3355_v23 = vpop.f32.mrb[102].mxu1 }
 0x730   :  { %v2187_v24 = vadd.f32 %v3355_v23, %v4065_v11  ;;  %v2181_v25 = vpop.f32.mrb[103].mxu1 }
 0x731   :  { %v2182_v27 = vadd.f32 %v4065_v11, %v2181_v25 }
 0x732   :  { %2317 = vst [vmem:[#allocation8 + $0x38] sm:$0xff] %v2187_v24 }
 0x733   :  { %2316 = vst [vmem:[#allocation8 + $0x30] sm:$0xff] %v2182_v27  ;;  %v3358_v28 = vpop.f32.mrb[104].mxu1 }
 0x734   :  { %v2197_v29 = vadd.f32 %v3358_v28, %v4065_v11  ;;  %v2191_v30 = vpop.f32.mrb[105].mxu1 }
 0x735   :  { %v2192_v31 = vadd.f32 %v4065_v11, %v2191_v30 }
 0x736   :  { %2319 = vst [vmem:[#allocation8 + $0x48] sm:$0xff] %v2197_v29 }
 0x737   :  { %2318 = vst [vmem:[#allocation8 + $0x40] sm:$0xff] %v2192_v31  ;;  %v3361_v32 = vpop.f32.mrb[106].mxu1 }
 0x738   :  { %v2207_v34 = vadd.f32 %v3361_v32, %v4065_v11  ;;  %v2201_v35 = vpop.f32.mrb[107].mxu1 }
 0x739   :  { %v2202_v36 = vadd.f32 %v4065_v11, %v2201_v35 }
 0x73a   :  { %2321 = vst [vmem:[#allocation8 + $0x58] sm:$0xff] %v2207_v34 }
 0x73b   :  { %2320 = vst [vmem:[#allocation8 + $0x50] sm:$0xff] %v2202_v36  ;;  %v3364_v37 = vpop.f32.mrb[108].mxu1 }
 0x73c   :  { %v2217_v38 = vadd.f32 %v3364_v37, %v4065_v11  ;;  %v2211_v39 = vpop.f32.mrb[109].mxu1 }
 0x73d   :  { %v2212_v41 = vadd.f32 %v4065_v11, %v2211_v39 }
 0x73e   :  { %2323 = vst [vmem:[#allocation8 + $0x68] sm:$0xff] %v2217_v38 }
 0x73f   :  { %2322 = vst [vmem:[#allocation8 + $0x60] sm:$0xff] %v2212_v41  ;;  %v3367_v42 = vpop.f32.mrb[110].mxu1 }
 0x740   :  { %v2227_v43 = vadd.f32 %v3367_v42, %v4065_v11  ;;  %v2221_v45 = vpop.f32.mrb[111].mxu1 }
 0x741   :  { %v2222_v46 = vadd.f32 %v4065_v11, %v2221_v45 }
 0x742   :  { %2325 = vst [vmem:[#allocation8 + $0x78] sm:$0xff] %v2227_v43 }
 0x743   :  { %2324 = vst [vmem:[#allocation8 + $0x70] sm:$0xff] %v2222_v46  ;;  %v3370_v47 = vpop.f32.mrb[112].mxu1 }
 0x744   :  { %v2237_v48 = vadd.f32 %v3370_v47, %v4065_v11  ;;  %v2231_v49 = vpop.f32.mrb[113].mxu1 }
 0x745   :  { %v2232_v50 = vadd.f32 %v4065_v11, %v2231_v49 }
 0x746   :  { %2327 = vst [vmem:[#allocation8 + $0x88] sm:$0xff] %v2237_v48 }
 0x747   :  { %2326 = vst [vmem:[#allocation8 + $0x80] sm:$0xff] %v2232_v50  ;;  %v3373_v51 = vpop.f32.mrb[114].mxu1 }
 0x748   :  { %v2247_v52 = vadd.f32 %v3373_v51, %v4065_v11  ;;  %v2241_v26 = vpop.f32.mrb[115].mxu1 }
 0x749   :  { %v2242_v53 = vadd.f32 %v4065_v11, %v2241_v26 }
 0x74a   :  { %2329 = vst [vmem:[#allocation8 + $0x98] sm:$0xff] %v2247_v52 }
 0x74b   :  { %2328 = vst [vmem:[#allocation8 + $0x90] sm:$0xff] %v2242_v53  ;;  %v3376_v54 = vpop.f32.mrb[116].mxu1 }
 0x74c   :  { %v2257_v55 = vadd.f32 %v3376_v54, %v4065_v11  ;;  %v2251_v56 = vpop.f32.mrb[117].mxu1 }
 0x74d   :  { %v2252_v57 = vadd.f32 %v4065_v11, %v2251_v56 }
 0x74e   :  { %2331 = vst [vmem:[#allocation8 + $0xa8] sm:$0xff] %v2257_v55 }
 0x74f   :  { %2330 = vst [vmem:[#allocation8 + $0xa0] sm:$0xff] %v2252_v57  ;;  %v3379_v58 = vpop.f32.mrb[118].mxu1 }
 0x750   :  { %v2267_v59 = vadd.f32 %v3379_v58, %v4065_v11  ;;  %v2261_v33 = vpop.f32.mrb[119].mxu1 }
 0x751   :  { %v2262_v60 = vadd.f32 %v4065_v11, %v2261_v33 }
 0x752   :  { %2333 = vst [vmem:[#allocation8 + $0xb8] sm:$0xff] %v2267_v59 }
 0x753   :  { %2332 = vst [vmem:[#allocation8 + $0xb0] sm:$0xff] %v2262_v60  ;;  %v3382_v61 = vpop.f32.mrb[120].mxu1 }
 0x754   :  { %v2277_v62 = vadd.f32 %v3382_v61, %v4065_v11  ;;  %v2271_v63 = vpop.f32.mrb[121].mxu1 }
 0x755   :  { %v2272_v0 = vadd.f32 %v4065_v11, %v2271_v63 }
 0x756   :  { %2335 = vst [vmem:[#allocation8 + $0xc8] sm:$0xff] %v2277_v62 }
 0x757   :  { %2334 = vst [vmem:[#allocation8 + $0xc0] sm:$0xff] %v2272_v0  ;;  %v3385_v1 = vpop.f32.mrb[122].mxu1 }
 0x758   :  { %v2287_v40 = vadd.f32 %v3385_v1, %v4065_v11  ;;  %v2281_v2 = vpop.f32.mrb[123].mxu1 }
 0x759   :  { %v2282_v3 = vadd.f32 %v4065_v11, %v2281_v2 }
 0x75a   :  { %2337 = vst [vmem:[#allocation8 + $0xd8] sm:$0xff] %v2287_v40 }
 0x75b   :  { %2336 = vst [vmem:[#allocation8 + $0xd0] sm:$0xff] %v2282_v3  ;;  %v3388_v4 = vpop.f32.mrb[124].mxu1 }
 0x75c   :  { %v2297_v5 = vadd.f32 %v3388_v4, %v4065_v11  ;;  %v2291_v6 = vpop.f32.mrb[125].mxu1 }
 0x75d   :  { %v2292_v7 = vadd.f32 %v4065_v11, %v2291_v6 }
 0x75e   :  { %2339 = vst [vmem:[#allocation8 + $0xe8] sm:$0xff] %v2297_v5 }
 0x75f   :  { %2338 = vst [vmem:[#allocation8 + $0xe0] sm:$0xff] %v2292_v7  ;;  %v3391_v8 = vpop.f32.mrb[126].mxu1 }
 0x760   :  { %v2307_v9 = vadd.f32 %v3391_v8, %v4065_v11  ;;  %v2301_v10 = vpop.f32.mrb[127].mxu1 }
 0x761   :  { %v2302_v12 = vadd.f32 %v4065_v11, %v2301_v10 }
 0x762   :  { %2341 = vst [vmem:[#allocation8 + $0xf8] sm:$0xff] %v2307_v9 }
 0x763   :  { %2340 = vst [vmem:[#allocation8 + $0xf0] sm:$0xff] %v2302_v12 }
 0x764   :  { %3733 = shalt.err (!%p3730_p0)
}
 0x765   :  { %s3734_s29 = scalar_lea.hbm %s4117_s3, 4096 }
 0x766   :  { %p3735_p1 = scmp.ne.s32.totalorder %s4117_s3, %s3734_s29  ;;  %p3738_p2 = scmp.lt.u32.totalorder %s3734_s29, %s4117_s3 }
 0x768   :  { %p3740_p3 = pnand %p3738_p2, %p3735_p1 }
 0x76a   :  { %3743 = shalt.err (!%p3740_p3)
}
 0x76b   :  { %2353 = dma.vmem_to_hbm [thread:$0]  %s2348_s23, 4096, %s4117_s3, [#allocation4], %s3752_s24, %s3752_s24, %s3753_s25  }
 0x76c   :  { %3748 = dma.done.wait [#allocation4], 4096  }
 0x76d   :  { %3749 = vsyncadd [#allocation4], 4294963200 }
 0x76e   :  { %2357 = vsyncpa [#allocation3], 1 }
 0x76f   :  { %2358 = vsyncpa [#allocation6], 1 }
 0x770   :  { %2359 = vsyncpa [#allocation4], 1 }

</bundles_post_ra>
